<compile_context>
chip_gen: v7x
topology: tpu7x:2x2x1
jax: 0.10.0
libtpu: 0.0.40
codegen_flags: <defaults>
</compile_context>

<pallas_src>
import functools

import numpy as np
import jax
import jax.numpy as jnp
from jax.experimental import pallas as pl
from jax.experimental.pallas import tpu as pltpu


# ------------------------------ parameter init -------------------------------

def _conv_w(key, cin, cout):
    # HWIO (3, 3, Cin, Cout)
    return jax.random.normal(key, (3, 3, cin, cout), jnp.float32) / jnp.sqrt(9.0 * cin)


def _bn_fold(key, c, eps=1e-5):
    k1, k2, k3, k4 = jax.random.split(key, 4)
    gamma = jax.random.uniform(k1, (c,), jnp.float32, 0.5, 1.5)
    beta = 0.1 * jax.random.normal(k2, (c,), jnp.float32)
    mean = 0.1 * jax.random.normal(k3, (c,), jnp.float32)
    var = jax.random.uniform(k4, (c,), jnp.float32, 0.5, 1.5)
    scale = gamma / jnp.sqrt(var + eps)
    bias = beta - mean * scale
    return scale, bias


def init_octave_cbr(key, cin, cout, alpha=0.5):
    """Raw per-branch OctaveCBR parameters (used by the reference and by the fusion)."""
    c_l_in = int(alpha * cin)
    c_h_in = cin - c_l_in
    c_l_out = int(alpha * cout)
    c_h_out = cout - c_l_out
    ks = jax.random.split(key, 6)
    scale_h, bias_h = _bn_fold(ks[4], c_h_out)
    scale_l, bias_l = _bn_fold(ks[5], c_l_out)
    return dict(
        w_hh=_conv_w(ks[0], c_h_in, c_h_out),
        w_lh=_conv_w(ks[1], c_l_in, c_h_out),
        w_hl=_conv_w(ks[2], c_h_in, c_l_out),
        w_ll=_conv_w(ks[3], c_l_in, c_l_out),
        scale_h=scale_h, bias_h=bias_h, scale_l=scale_l, bias_l=bias_l,
        c_h_in=c_h_in, c_l_in=c_l_in, c_h_out=c_h_out, c_l_out=c_l_out)


def fuse_octave_stage(p):
    """Fold one OctaveCBR (h2h/l2h/h2l/l2l convs + 2x2 avg-pool + nearest 2x
    upsample + folded BN) into a SINGLE dense 3x3 conv acting on the
    space-to-depth-packed combined tensor (channels = [s2d(high) | low])."""
    chi, cli = p["c_h_in"], p["c_l_in"]
    cho, clo = p["c_h_out"], p["c_l_out"]
    cin, cout = 4 * chi + cli, 4 * cho + clo
    w_hh = np.asarray(p["w_hh"])
    w_lh = np.asarray(p["w_lh"])
    w_hl = np.asarray(p["w_hl"])
    w_ll = np.asarray(p["w_ll"])
    sh = np.asarray(p["scale_h"])
    sl = np.asarray(p["scale_l"])
    w = np.zeros((3, 3, cin, cout), np.float32)

    # h2h: exact space-to-depth remap of the full-resolution 3x3 conv.
    # Output sub-pixel (u,v), input sub-pixel (u',v'):
    #   full-res tap ky = 2*ky' + u' - u - 1 (kept iff 0<=ky<=2), same for kx.
    for u in range(2):
        for v in range(2):
            for up_ in range(2):
                for vp in range(2):
                    for kyp in range(3):
                        ky = 2 * kyp + up_ - u - 1
                        if not 0 <= ky <= 2:
                            continue
                        for kxp in range(3):
                            kx = 2 * kxp + vp - v - 1
                            if not 0 <= kx <= 2:
                                continue
                            w[kyp, kxp,
                              (2 * up_ + vp) * chi:(2 * up_ + vp + 1) * chi,
                              (2 * u + v) * cho:(2 * u + v + 1) * cho] = (
                                  w_hh[ky, kx] * sh[None, :])
    # l2h: low-res conv whose result is nearest-upsampled -> broadcast into all
    # four output sub-pixel channel groups.
    for u in range(2):
        for v in range(2):
            w[:, :, 4 * chi:, (2 * u + v) * cho:(2 * u + v + 1) * cho] = (
                w_lh * sh[None, None, None, :])
    # h2l: conv(avg_pool(x_h)) -> pool folded as 0.25 weight on every input
    # sub-pixel channel group.
    for up_ in range(2):
        for vp in range(2):
            w[:, :, (2 * up_ + vp) * chi:(2 * up_ + vp + 1) * chi, 4 * cho:] = (
                0.25 * w_hl * sl[None, None, None, :])
    # l2l
    w[:, :, 4 * chi:, 4 * cho:] = w_ll * sl[None, None, None, :]

    b = np.concatenate([np.tile(np.asarray(p["bias_h"]), 4), np.asarray(p["bias_l"])])
    return dict(
        # (9, Cin, Cout) bf16 weights (tap index = ky*3+kx), f32 bias.
        w=jnp.asarray(w.reshape(9, cin, cout), jnp.bfloat16),
        b=jnp.asarray(b.reshape(1, cout), jnp.float32),
        c_h_out=cho, c_l_out=clo, c_in=cin, c_out=cout)


# ---------------------------- layout plumbing (XLA) ---------------------------

def space_to_depth(x):
    # (N, H, W, C) -> (N, H/2, W/2, 4*C); channel index = (2*u + v)*C + c.
    n, h, w, c = x.shape
    x = x.reshape(n, h // 2, 2, w // 2, 2, c)
    x = x.transpose(0, 1, 3, 2, 4, 5)
    return x.reshape(n, h // 2, w // 2, 4 * c)


def depth_to_space(x, c):
    # inverse of space_to_depth
    n, hl, wl, _ = x.shape
    x = x.reshape(n, hl, wl, 2, 2, c)
    x = x.transpose(0, 1, 3, 2, 4, 5)
    return x.reshape(n, 2 * hl, 2 * wl, c)


# ------------------------------ the Pallas kernel -----------------------------

def _octave_bottleneck_kernel(z_ref, w1_ref, b1_ref, w2_ref, b2_ref, out_ref,
                              pad1_ref, pad2_ref, *, hl, wl):
    m = hl * wl

    def conv3x3_relu(pad_ref, x3d, w_ref, b_ref):
        """3x3 SAME conv + bias + ReLU on one (hl, wl, cin) image.

        The conv is 9 accumulated MXU matmuls read straight out of the
        zero-padded VMEM buffer: one sublane-shifted view per kx, and the three
        ky taps are contiguous, 8-aligned row windows of that view.  bf16
        operands, f32 accumulation."""
        cin = pad_ref.shape[-1]
        cout = w_ref.shape[-1]
        # Zero only the 1-pixel halo (corners covered by the full-width rows),
        # then write the interior once.
        pad_ref[0, :, :] = jnp.zeros((wl + 2, cin), jnp.float32)
        pad_ref[hl + 1, :, :] = jnp.zeros((wl + 2, cin), jnp.float32)
        pad_ref[1:hl + 1, 0, :] = jnp.zeros((hl, cin), jnp.float32)
        pad_ref[1:hl + 1, wl + 1, :] = jnp.zeros((hl, cin), jnp.float32)
        pad_ref[1:hl + 1, 1:wl + 1, :] = x3d

        acc = jnp.zeros((m, cout), jnp.float32)
        for kx in range(3):
            col = pad_ref[:, kx:kx + wl, :].reshape((hl + 2) * wl, cin)
            col = col.astype(jnp.bfloat16)
            for ky in range(3):
                tap = col[ky * wl:ky * wl + m, :]          # 8-aligned row window
                acc = acc + jnp.dot(tap, w_ref[ky * 3 + kx],
                                    preferred_element_type=jnp.float32)
        return jnp.maximum(acc + b_ref[...], 0.0)

    z3d = z_ref[0]                                             # (hl, wl, c_in) f32
    c_in = z3d.shape[-1]
    c_mid = w1_ref.shape[-1]
    c_out = w2_ref.shape[-1]

    # OctaveCBR #1 and #2, each as one dense 3x3 conv on the combined tensor.
    y1 = conv3x3_relu(pad1_ref, z3d, w1_ref, b1_ref)           # (m, c_mid)
    y2 = conv3x3_relu(pad2_ref, y1.reshape(hl, wl, c_mid), w2_ref, b2_ref)  # (m, c_out)

    # Fused per-branch residual add + final ReLU (c_out == c_in, checked by wrapper).
    res = z3d.reshape(m, c_in)
    out = jnp.maximum(y2 + res, 0.0)
    out_ref[...] = out.reshape(1, hl, wl, c_out)


def octave_bottleneck_call(z, w1, b1, w2, b2):
    n, hl, wl, c_in = z.shape
    c_mid = w1.shape[-1]
    c_out = w2.shape[-1]
    assert w1.shape == (9, c_in, c_mid)
    assert w2.shape == (9, c_mid, c_out)
    assert c_out == c_in, "residual add requires matching in/out channels"

    kernel = functools.partial(_octave_bottleneck_kernel, hl=hl, wl=wl)
    return pl.pallas_call(
        kernel,
        out_shape=jax.ShapeDtypeStruct((n, hl, wl, c_out), jnp.float32),
        grid=(n,),
        in_specs=[
            pl.BlockSpec((1, hl, wl, c_in), lambda i: (i, 0, 0, 0)),
            # Weights / biases: constant index maps -> fetched once, VMEM-resident.
            pl.BlockSpec((9, c_in, c_mid), lambda i: (0, 0, 0)),
            pl.BlockSpec((1, c_mid), lambda i: (0, 0)),
            pl.BlockSpec((9, c_mid, c_out), lambda i: (0, 0, 0)),
            pl.BlockSpec((1, c_out), lambda i: (0, 0)),
        ],
        out_specs=pl.BlockSpec((1, hl, wl, c_out), lambda i: (i, 0, 0, 0)),
        scratch_shapes=[
            pltpu.VMEM((hl + 2, wl + 2, c_in), jnp.float32),    # padded stage-1 input
            pltpu.VMEM((hl + 2, wl + 2, c_mid), jnp.float32),   # padded stage-2 input
        ],
        compiler_params=pltpu.CompilerParams(
            dimension_semantics=("parallel",)),   # batch split across v7x TCs
    )(z, w1, b1, w2, b2)


def bottleneck_forward(x_h, x_l, f1, f2):
    n, h, w, c_h = x_h.shape
    _, hl, wl, c_l = x_l.shape
    assert hl == h // 2 and wl == w // 2
    assert f1["c_in"] == 4 * c_h + c_l
    assert f2["c_out"] == 4 * c_h + c_l          # downsample=None, expansion=1

    # Free layout plumbing outside the kernel: pack high branch with
    # space-to-depth and concatenate with the low branch.
    z = jnp.concatenate([space_to_depth(x_h), x_l], axis=-1)   # (n, hl, wl, 4*c_h + c_l)
    out = octave_bottleneck_call(z, f1["w"], f1["b"], f2["w"], f2["b"])
    y_h = depth_to_space(out[..., :4 * c_h], c_h)
    y_l = out[..., 4 * c_h:]
    return y_h, y_l


# ------------------------------ pure-JAX reference ----------------------------

def reference_forward(x_h, x_l, p1, p2):
    def conv(x, w):
        return jax.lax.conv_general_dilated(
            x, w, (1, 1), "SAME",
            dimension_numbers=("NHWC", "HWIO", "NHWC"),
            precision=jax.lax.Precision.HIGHEST)

    def pool(x):
        n, h, w, c = x.shape
        return x.reshape(n, h // 2, 2, w // 2, 2, c).mean(axis=(2, 4))

    def up(x):
        n, h, w, c = x.shape
        x = jnp.broadcast_to(x[:, :, None, :, None, :], (n, h, 2, w, 2, c))
        return x.reshape(n, 2 * h, 2 * w, c)

    def ocb(xh, xl, p):
        y_h = (conv(xh, p["w_hh"] * p["scale_h"])
               + up(conv(xl, p["w_lh"] * p["scale_h"]))
               + p["bias_h"])
        y_l = (conv(xl, p["w_ll"] * p["scale_l"])
               + conv(pool(xh), p["w_hl"] * p["scale_l"])
               + p["bias_l"])
        return jax.nn.relu(y_h), jax.nn.relu(y_l)

    h1, l1 = ocb(x_h, x_l, p1)
    h2, l2 = ocb(h1, l1, p2)
    return jax.nn.relu(h2 + x_h), jax.nn.relu(l2 + x_l)


# ------------------------------------ main ------------------------------------

if __name__ == "__main__":
    key = jax.random.PRNGKey(0)
    k_xh, k_xl, k_p1, k_p2 = jax.random.split(key, 4)

    # Bottleneck(inplanes=8, planes=8, stride=1, groups=1, downsample=None, First=False)
    N, H, W = 2, 16, 16
    inplanes, planes = 8, 8
    width = planes                      # int(planes * 64/64) * 1

    c_l_in = inplanes // 2
    c_h_in = inplanes - c_l_in
    x_h = jax.random.normal(k_xh, (N, H, W, c_h_in), jnp.float32)
    x_l = jax.random.normal(k_xl, (N, H // 2, W // 2, c_l_in), jnp.float32)

    p1 = init_octave_cbr(k_p1, inplanes, width)
    p2 = init_octave_cbr(k_p2, width, planes)
    f1 = fuse_octave_stage(p1)          # (9, 20, 20) bf16, (1, 20) f32
    f2 = fuse_octave_stage(p2)

    y_h, y_l = bottleneck_forward(x_h, x_l, f1, f2)
    y_h, y_l = jax.block_until_ready((y_h, y_l))

    assert y_h.shape == (N, H, W, c_h_in), y_h.shape
    assert y_l.shape == (N, H // 2, W // 2, c_l_in), y_l.shape
    assert bool(jnp.all(jnp.isfinite(y_h))) and bool(jnp.all(jnp.isfinite(y_l)))

    ref_h, ref_l = reference_forward(x_h, x_l, p1, p2)
    # bf16 MXU operands (f32 accumulate) across two stacked 3x3 convs: use a
    # scale-aware relative tolerance.  Real indexing / weight-fusion bugs produce
    # O(1) relative errors, ~10-100x above this bound.
    rel_h = float(jnp.max(jnp.abs(y_h - ref_h) / (1.0 + jnp.abs(ref_h))))
    rel_l = float(jnp.max(jnp.abs(y_l - ref_l) / (1.0 + jnp.abs(ref_l))))
    assert rel_h < 0.1 and rel_l < 0.1, (rel_h, rel_l)

    print("KERNEL_OK")
</pallas_src>

<mosaic_0001>
module attributes {stable_mosaic.version = 11 : i64} {
  func.func @_octave_bottleneck_kernel(%arg0: i32, %arg1: memref<1x8x8x20xf32, #tpu.memory_space<vmem>>, %arg2: memref<9x20x20xbf16, #tpu.memory_space<vmem>>, %arg3: memref<1x20xf32, #tpu.memory_space<vmem>>, %arg4: memref<9x20x20xbf16, #tpu.memory_space<vmem>>, %arg5: memref<1x20xf32, #tpu.memory_space<vmem>>, %arg6: memref<1x8x8x20xf32, #tpu.memory_space<vmem>>, %arg7: memref<10x10x20xf32, #tpu.memory_space<vmem>>, %arg8: memref<10x10x20xf32, #tpu.memory_space<vmem>>) attributes {dimension_semantics = [#tpu.dimension_semantics<parallel>], iteration_bounds = array<i64: 2>, scalar_prefetch = 0 : i64, scratch_operands = 2 : i64, tpu.core_type = #tpu.core_type<tc>, window_params = [{transform_indices = @transform_0, window_bounds = array<i64: 1, 8, 8, 20>}, {pipeline_mode = #tpu.pipeline_mode<synchronous>, transform_indices = @transform_1, window_bounds = array<i64: 9, 20, 20>}, {pipeline_mode = #tpu.pipeline_mode<synchronous>, transform_indices = @transform_2, window_bounds = array<i64: 1, 20>}, {pipeline_mode = #tpu.pipeline_mode<synchronous>, transform_indices = @transform_3, window_bounds = array<i64: 9, 20, 20>}, {pipeline_mode = #tpu.pipeline_mode<synchronous>, transform_indices = @transform_4, window_bounds = array<i64: 1, 20>}, {transform_indices = @transform_5, window_bounds = array<i64: 1, 8, 8, 20>}]} {
    %c0 = arith.constant 0 : index
    %c0_0 = arith.constant 0 : index
    %c0_1 = arith.constant 0 : index
    %c0_2 = arith.constant 0 : index
    %0 = vector.load %arg1[%c0, %c0_0, %c0_1, %c0_2] : memref<1x8x8x20xf32, #tpu.memory_space<vmem>>, vector<1x8x8x20xf32>
    %1 = vector.shape_cast %0 : vector<1x8x8x20xf32> to vector<8x8x20xf32>
    %cst = arith.constant 0.000000e+00 : f32
    %2 = vector.broadcast %cst : f32 to vector<10x20xf32>
    %c0_3 = arith.constant 0 : index
    %c0_4 = arith.constant 0 : index
    %c0_5 = arith.constant 0 : index
    %3 = vector.load %arg7[%c0_3, %c0_4, %c0_5] : memref<10x10x20xf32, #tpu.memory_space<vmem>>, vector<1x10x20xf32>
    %4 = vector.shape_cast %3 : vector<1x10x20xf32> to vector<10x20xf32>
    %5 = vector.shape_cast %2 : vector<10x20xf32> to vector<1x10x20xf32>
    tpu.vector_store %arg7[%c0_3, %c0_4, %c0_5], %5 {strides = array<i32>} : memref<10x10x20xf32, #tpu.memory_space<vmem>>, vector<1x10x20xf32>,
    %cst_6 = arith.constant 0.000000e+00 : f32
    %6 = vector.broadcast %cst_6 : f32 to vector<10x20xf32>
    %c9 = arith.constant 9 : index
    %c0_7 = arith.constant 0 : index
    %c0_8 = arith.constant 0 : index
    %7 = vector.load %arg7[%c9, %c0_7, %c0_8] : memref<10x10x20xf32, #tpu.memory_space<vmem>>, vector<1x10x20xf32>
    %8 = vector.shape_cast %7 : vector<1x10x20xf32> to vector<10x20xf32>
    %9 = vector.shape_cast %6 : vector<10x20xf32> to vector<1x10x20xf32>
    tpu.vector_store %arg7[%c9, %c0_7, %c0_8], %9 {strides = array<i32>} : memref<10x10x20xf32, #tpu.memory_space<vmem>>, vector<1x10x20xf32>,
    %cst_9 = arith.constant 0.000000e+00 : f32
    %10 = vector.broadcast %cst_9 : f32 to vector<8x20xf32>
    %c1 = arith.constant 1 : index
    %c0_10 = arith.constant 0 : index
    %c0_11 = arith.constant 0 : index
    %11 = vector.load %arg7[%c1, %c0_10, %c0_11] : memref<10x10x20xf32, #tpu.memory_space<vmem>>, vector<8x1x20xf32>
    %12 = vector.shape_cast %11 : vector<8x1x20xf32> to vector<8x20xf32>
    %13 = vector.shape_cast %10 : vector<8x20xf32> to vector<8x1x20xf32>
    tpu.vector_store %arg7[%c1, %c0_10, %c0_11], %13 {strides = array<i32>} : memref<10x10x20xf32, #tpu.memory_space<vmem>>, vector<8x1x20xf32>,
    %cst_12 = arith.constant 0.000000e+00 : f32
    %14 = vector.broadcast %cst_12 : f32 to vector<8x20xf32>
    %c1_13 = arith.constant 1 : index
    %c9_14 = arith.constant 9 : index
    %c0_15 = arith.constant 0 : index
    %15 = vector.load %arg7[%c1_13, %c9_14, %c0_15] : memref<10x10x20xf32, #tpu.memory_space<vmem>>, vector<8x1x20xf32>
    %16 = vector.shape_cast %15 : vector<8x1x20xf32> to vector<8x20xf32>
    %17 = vector.shape_cast %14 : vector<8x20xf32> to vector<8x1x20xf32>
    tpu.vector_store %arg7[%c1_13, %c9_14, %c0_15], %17 {strides = array<i32>} : memref<10x10x20xf32, #tpu.memory_space<vmem>>, vector<8x1x20xf32>,
    %c1_16 = arith.constant 1 : index
    %c1_17 = arith.constant 1 : index
    %c0_18 = arith.constant 0 : index
    %18 = vector.load %arg7[%c1_16, %c1_17, %c0_18] : memref<10x10x20xf32, #tpu.memory_space<vmem>>, vector<8x8x20xf32>
    tpu.vector_store %arg7[%c1_16, %c1_17, %c0_18], %1 {strides = array<i32>} : memref<10x10x20xf32, #tpu.memory_space<vmem>>, vector<8x8x20xf32>,
    %cst_19 = arith.constant 0.000000e+00 : f32
    %19 = vector.broadcast %cst_19 : f32 to vector<64x20xf32>
    %c0_20 = arith.constant 0 : index
    %c0_21 = arith.constant 0 : index
    %c0_22 = arith.constant 0 : index
    %20 = vector.load %arg7[%c0_20, %c0_21, %c0_22] : memref<10x10x20xf32, #tpu.memory_space<vmem>>, vector<10x8x20xf32>
    %21 = vector.shape_cast %20 : vector<10x8x20xf32> to vector<80x20xf32>
    %22 = arith.truncf %21 : vector<80x20xf32> to vector<80x20xbf16>
    %23 = vector.extract_strided_slice %22 {offsets = [0, 0], sizes = [64, 20], strides = [1, 1]} : vector<80x20xbf16> to vector<64x20xbf16>
    %c0_23 = arith.constant 0 : index
    %c0_24 = arith.constant 0 : index
    %c0_25 = arith.constant 0 : index
    %24 = vector.load %arg2[%c0_23, %c0_24, %c0_25] : memref<9x20x20xbf16, #tpu.memory_space<vmem>>, vector<1x20x20xbf16>
    %25 = vector.shape_cast %24 : vector<1x20x20xbf16> to vector<20x20xbf16>
    %cst_26 = arith.constant dense<0.000000e+00> : vector<64x20xf32>
    %26 = tpu.matmul %23, %25, %cst_26 {dimension_numbers = #tpu.dot_dimension_numbers<[1], [0], [0], [1], [0, 0, 1, 1], [], []>} : vector<64x20xbf16>, vector<20x20xbf16>, vector<64x20xf32> -> vector<64x20xf32>
    %27 = arith.addf %19, %26 : vector<64x20xf32>
    %28 = vector.extract_strided_slice %22 {offsets = [8, 0], sizes = [64, 20], strides = [1, 1]} : vector<80x20xbf16> to vector<64x20xbf16>
    %c3 = arith.constant 3 : index
    %c0_27 = arith.constant 0 : index
    %c0_28 = arith.constant 0 : index
    %29 = vector.load %arg2[%c3, %c0_27, %c0_28] : memref<9x20x20xbf16, #tpu.memory_space<vmem>>, vector<1x20x20xbf16>
    %30 = vector.shape_cast %29 : vector<1x20x20xbf16> to vector<20x20xbf16>
    %cst_29 = arith.constant dense<0.000000e+00> : vector<64x20xf32>
    %31 = tpu.matmul %28, %30, %cst_29 {dimension_numbers = #tpu.dot_dimension_numbers<[1], [0], [0], [1], [0, 0, 1, 1], [], []>} : vector<64x20xbf16>, vector<20x20xbf16>, vector<64x20xf32> -> vector<64x20xf32>
    %32 = arith.addf %27, %31 : vector<64x20xf32>
    %33 = vector.extract_strided_slice %22 {offsets = [16, 0], sizes = [64, 20], strides = [1, 1]} : vector<80x20xbf16> to vector<64x20xbf16>
    %c6 = arith.constant 6 : index
    %c0_30 = arith.constant 0 : index
    %c0_31 = arith.constant 0 : index
    %34 = vector.load %arg2[%c6, %c0_30, %c0_31] : memref<9x20x20xbf16, #tpu.memory_space<vmem>>, vector<1x20x20xbf16>
    %35 = vector.shape_cast %34 : vector<1x20x20xbf16> to vector<20x20xbf16>
    %cst_32 = arith.constant dense<0.000000e+00> : vector<64x20xf32>
    %36 = tpu.matmul %33, %35, %cst_32 {dimension_numbers = #tpu.dot_dimension_numbers<[1], [0], [0], [1], [0, 0, 1, 1], [], []>} : vector<64x20xbf16>, vector<20x20xbf16>, vector<64x20xf32> -> vector<64x20xf32>
    %37 = arith.addf %32, %36 : vector<64x20xf32>
    %c0_33 = arith.constant 0 : index
    %c1_34 = arith.constant 1 : index
    %c0_35 = arith.constant 0 : index
    %38 = vector.load %arg7[%c0_33, %c1_34, %c0_35] : memref<10x10x20xf32, #tpu.memory_space<vmem>>, vector<10x8x20xf32>
    %39 = vector.shape_cast %38 : vector<10x8x20xf32> to vector<80x20xf32>
    %40 = arith.truncf %39 : vector<80x20xf32> to vector<80x20xbf16>
    %41 = vector.extract_strided_slice %40 {offsets = [0, 0], sizes = [64, 20], strides = [1, 1]} : vector<80x20xbf16> to vector<64x20xbf16>
    %c1_36 = arith.constant 1 : index
    %c0_37 = arith.constant 0 : index
    %c0_38 = arith.constant 0 : index
    %42 = vector.load %arg2[%c1_36, %c0_37, %c0_38] : memref<9x20x20xbf16, #tpu.memory_space<vmem>>, vector<1x20x20xbf16>
    %43 = vector.shape_cast %42 : vector<1x20x20xbf16> to vector<20x20xbf16>
    %cst_39 = arith.constant dense<0.000000e+00> : vector<64x20xf32>
    %44 = tpu.matmul %41, %43, %cst_39 {dimension_numbers = #tpu.dot_dimension_numbers<[1], [0], [0], [1], [0, 0, 1, 1], [], []>} : vector<64x20xbf16>, vector<20x20xbf16>, vector<64x20xf32> -> vector<64x20xf32>
    %45 = arith.addf %37, %44 : vector<64x20xf32>
    %46 = vector.extract_strided_slice %40 {offsets = [8, 0], sizes = [64, 20], strides = [1, 1]} : vector<80x20xbf16> to vector<64x20xbf16>
    %c4 = arith.constant 4 : index
    %c0_40 = arith.constant 0 : index
    %c0_41 = arith.constant 0 : index
    %47 = vector.load %arg2[%c4, %c0_40, %c0_41] : memref<9x20x20xbf16, #tpu.memory_space<vmem>>, vector<1x20x20xbf16>
    %48 = vector.shape_cast %47 : vector<1x20x20xbf16> to vector<20x20xbf16>
    %cst_42 = arith.constant dense<0.000000e+00> : vector<64x20xf32>
    %49 = tpu.matmul %46, %48, %cst_42 {dimension_numbers = #tpu.dot_dimension_numbers<[1], [0], [0], [1], [0, 0, 1, 1], [], []>} : vector<64x20xbf16>, vector<20x20xbf16>, vector<64x20xf32> -> vector<64x20xf32>
    %50 = arith.addf %45, %49 : vector<64x20xf32>
    %51 = vector.extract_strided_slice %40 {offsets = [16, 0], sizes = [64, 20], strides = [1, 1]} : vector<80x20xbf16> to vector<64x20xbf16>
    %c7 = arith.constant 7 : index
    %c0_43 = arith.constant 0 : index
    %c0_44 = arith.constant 0 : index
    %52 = vector.load %arg2[%c7, %c0_43, %c0_44] : memref<9x20x20xbf16, #tpu.memory_space<vmem>>, vector<1x20x20xbf16>
    %53 = vector.shape_cast %52 : vector<1x20x20xbf16> to vector<20x20xbf16>
    %cst_45 = arith.constant dense<0.000000e+00> : vector<64x20xf32>
    %54 = tpu.matmul %51, %53, %cst_45 {dimension_numbers = #tpu.dot_dimension_numbers<[1], [0], [0], [1], [0, 0, 1, 1], [], []>} : vector<64x20xbf16>, vector<20x20xbf16>, vector<64x20xf32> -> vector<64x20xf32>
    %55 = arith.addf %50, %54 : vector<64x20xf32>
    %c0_46 = arith.constant 0 : index
    %c2 = arith.constant 2 : index
    %c0_47 = arith.constant 0 : index
    %56 = vector.load %arg7[%c0_46, %c2, %c0_47] : memref<10x10x20xf32, #tpu.memory_space<vmem>>, vector<10x8x20xf32>
    %57 = vector.shape_cast %56 : vector<10x8x20xf32> to vector<80x20xf32>
    %58 = arith.truncf %57 : vector<80x20xf32> to vector<80x20xbf16>
    %59 = vector.extract_strided_slice %58 {offsets = [0, 0], sizes = [64, 20], strides = [1, 1]} : vector<80x20xbf16> to vector<64x20xbf16>
    %c2_48 = arith.constant 2 : index
    %c0_49 = arith.constant 0 : index
    %c0_50 = arith.constant 0 : index
    %60 = vector.load %arg2[%c2_48, %c0_49, %c0_50] : memref<9x20x20xbf16, #tpu.memory_space<vmem>>, vector<1x20x20xbf16>
    %61 = vector.shape_cast %60 : vector<1x20x20xbf16> to vector<20x20xbf16>
    %cst_51 = arith.constant dense<0.000000e+00> : vector<64x20xf32>
    %62 = tpu.matmul %59, %61, %cst_51 {dimension_numbers = #tpu.dot_dimension_numbers<[1], [0], [0], [1], [0, 0, 1, 1], [], []>} : vector<64x20xbf16>, vector<20x20xbf16>, vector<64x20xf32> -> vector<64x20xf32>
    %63 = arith.addf %55, %62 : vector<64x20xf32>
    %64 = vector.extract_strided_slice %58 {offsets = [8, 0], sizes = [64, 20], strides = [1, 1]} : vector<80x20xbf16> to vector<64x20xbf16>
    %c5 = arith.constant 5 : index
    %c0_52 = arith.constant 0 : index
    %c0_53 = arith.constant 0 : index
    %65 = vector.load %arg2[%c5, %c0_52, %c0_53] : memref<9x20x20xbf16, #tpu.memory_space<vmem>>, vector<1x20x20xbf16>
    %66 = vector.shape_cast %65 : vector<1x20x20xbf16> to vector<20x20xbf16>
    %cst_54 = arith.constant dense<0.000000e+00> : vector<64x20xf32>
    %67 = tpu.matmul %64, %66, %cst_54 {dimension_numbers = #tpu.dot_dimension_numbers<[1], [0], [0], [1], [0, 0, 1, 1], [], []>} : vector<64x20xbf16>, vector<20x20xbf16>, vector<64x20xf32> -> vector<64x20xf32>
    %68 = arith.addf %63, %67 : vector<64x20xf32>
    %69 = vector.extract_strided_slice %58 {offsets = [16, 0], sizes = [64, 20], strides = [1, 1]} : vector<80x20xbf16> to vector<64x20xbf16>
    %c8 = arith.constant 8 : index
    %c0_55 = arith.constant 0 : index
    %c0_56 = arith.constant 0 : index
    %70 = vector.load %arg2[%c8, %c0_55, %c0_56] : memref<9x20x20xbf16, #tpu.memory_space<vmem>>, vector<1x20x20xbf16>
    %71 = vector.shape_cast %70 : vector<1x20x20xbf16> to vector<20x20xbf16>
    %cst_57 = arith.constant dense<0.000000e+00> : vector<64x20xf32>
    %72 = tpu.matmul %69, %71, %cst_57 {dimension_numbers = #tpu.dot_dimension_numbers<[1], [0], [0], [1], [0, 0, 1, 1], [], []>} : vector<64x20xbf16>, vector<20x20xbf16>, vector<64x20xf32> -> vector<64x20xf32>
    %73 = arith.addf %68, %72 : vector<64x20xf32>
    %c0_58 = arith.constant 0 : index
    %c0_59 = arith.constant 0 : index
    %74 = vector.load %arg3[%c0_58, %c0_59] : memref<1x20xf32, #tpu.memory_space<vmem>>, vector<1x20xf32>
    %75 = vector.broadcast %74 : vector<1x20xf32> to vector<64x20xf32>
    %76 = arith.addf %73, %75 : vector<64x20xf32>
    %cst_60 = arith.constant 0.000000e+00 : f32
    %77 = vector.broadcast %cst_60 : f32 to vector<64x20xf32>
    %78 = arith.maximumf %76, %77 : vector<64x20xf32>
    %79 = vector.shape_cast %78 : vector<64x20xf32> to vector<8x8x20xf32>
    %cst_61 = arith.constant 0.000000e+00 : f32
    %80 = vector.broadcast %cst_61 : f32 to vector<10x20xf32>
    %c0_62 = arith.constant 0 : index
    %c0_63 = arith.constant 0 : index
    %c0_64 = arith.constant 0 : index
    %81 = vector.load %arg8[%c0_62, %c0_63, %c0_64] : memref<10x10x20xf32, #tpu.memory_space<vmem>>, vector<1x10x20xf32>
    %82 = vector.shape_cast %81 : vector<1x10x20xf32> to vector<10x20xf32>
    %83 = vector.shape_cast %80 : vector<10x20xf32> to vector<1x10x20xf32>
    tpu.vector_store %arg8[%c0_62, %c0_63, %c0_64], %83 {strides = array<i32>} : memref<10x10x20xf32, #tpu.memory_space<vmem>>, vector<1x10x20xf32>,
    %cst_65 = arith.constant 0.000000e+00 : f32
    %84 = vector.broadcast %cst_65 : f32 to vector<10x20xf32>
    %c9_66 = arith.constant 9 : index
    %c0_67 = arith.constant 0 : index
    %c0_68 = arith.constant 0 : index
    %85 = vector.load %arg8[%c9_66, %c0_67, %c0_68] : memref<10x10x20xf32, #tpu.memory_space<vmem>>, vector<1x10x20xf32>
    %86 = vector.shape_cast %85 : vector<1x10x20xf32> to vector<10x20xf32>
    %87 = vector.shape_cast %84 : vector<10x20xf32> to vector<1x10x20xf32>
    tpu.vector_store %arg8[%c9_66, %c0_67, %c0_68], %87 {strides = array<i32>} : memref<10x10x20xf32, #tpu.memory_space<vmem>>, vector<1x10x20xf32>,
    %cst_69 = arith.constant 0.000000e+00 : f32
    %88 = vector.broadcast %cst_69 : f32 to vector<8x20xf32>
    %c1_70 = arith.constant 1 : index
    %c0_71 = arith.constant 0 : index
    %c0_72 = arith.constant 0 : index
    %89 = vector.load %arg8[%c1_70, %c0_71, %c0_72] : memref<10x10x20xf32, #tpu.memory_space<vmem>>, vector<8x1x20xf32>
    %90 = vector.shape_cast %89 : vector<8x1x20xf32> to vector<8x20xf32>
    %91 = vector.shape_cast %88 : vector<8x20xf32> to vector<8x1x20xf32>
    tpu.vector_store %arg8[%c1_70, %c0_71, %c0_72], %91 {strides = array<i32>} : memref<10x10x20xf32, #tpu.memory_space<vmem>>, vector<8x1x20xf32>,
    %cst_73 = arith.constant 0.000000e+00 : f32
    %92 = vector.broadcast %cst_73 : f32 to vector<8x20xf32>
    %c1_74 = arith.constant 1 : index
    %c9_75 = arith.constant 9 : index
    %c0_76 = arith.constant 0 : index
    %93 = vector.load %arg8[%c1_74, %c9_75, %c0_76] : memref<10x10x20xf32, #tpu.memory_space<vmem>>, vector<8x1x20xf32>
    %94 = vector.shape_cast %93 : vector<8x1x20xf32> to vector<8x20xf32>
    %95 = vector.shape_cast %92 : vector<8x20xf32> to vector<8x1x20xf32>
    tpu.vector_store %arg8[%c1_74, %c9_75, %c0_76], %95 {strides = array<i32>} : memref<10x10x20xf32, #tpu.memory_space<vmem>>, vector<8x1x20xf32>,
    %c1_77 = arith.constant 1 : index
    %c1_78 = arith.constant 1 : index
    %c0_79 = arith.constant 0 : index
    %96 = vector.load %arg8[%c1_77, %c1_78, %c0_79] : memref<10x10x20xf32, #tpu.memory_space<vmem>>, vector<8x8x20xf32>
    tpu.vector_store %arg8[%c1_77, %c1_78, %c0_79], %79 {strides = array<i32>} : memref<10x10x20xf32, #tpu.memory_space<vmem>>, vector<8x8x20xf32>,
    %cst_80 = arith.constant 0.000000e+00 : f32
    %97 = vector.broadcast %cst_80 : f32 to vector<64x20xf32>
    %c0_81 = arith.constant 0 : index
    %c0_82 = arith.constant 0 : index
    %c0_83 = arith.constant 0 : index
    %98 = vector.load %arg8[%c0_81, %c0_82, %c0_83] : memref<10x10x20xf32, #tpu.memory_space<vmem>>, vector<10x8x20xf32>
    %99 = vector.shape_cast %98 : vector<10x8x20xf32> to vector<80x20xf32>
    %100 = arith.truncf %99 : vector<80x20xf32> to vector<80x20xbf16>
    %101 = vector.extract_strided_slice %100 {offsets = [0, 0], sizes = [64, 20], strides = [1, 1]} : vector<80x20xbf16> to vector<64x20xbf16>
    %c0_84 = arith.constant 0 : index
    %c0_85 = arith.constant 0 : index
    %c0_86 = arith.constant 0 : index
    %102 = vector.load %arg4[%c0_84, %c0_85, %c0_86] : memref<9x20x20xbf16, #tpu.memory_space<vmem>>, vector<1x20x20xbf16>
    %103 = vector.shape_cast %102 : vector<1x20x20xbf16> to vector<20x20xbf16>
    %cst_87 = arith.constant dense<0.000000e+00> : vector<64x20xf32>
    %104 = tpu.matmul %101, %103, %cst_87 {dimension_numbers = #tpu.dot_dimension_numbers<[1], [0], [0], [1], [0, 0, 1, 1], [], []>} : vector<64x20xbf16>, vector<20x20xbf16>, vector<64x20xf32> -> vector<64x20xf32>
    %105 = arith.addf %97, %104 : vector<64x20xf32>
    %106 = vector.extract_strided_slice %100 {offsets = [8, 0], sizes = [64, 20], strides = [1, 1]} : vector<80x20xbf16> to vector<64x20xbf16>
    %c3_88 = arith.constant 3 : index
    %c0_89 = arith.constant 0 : index
    %c0_90 = arith.constant 0 : index
    %107 = vector.load %arg4[%c3_88, %c0_89, %c0_90] : memref<9x20x20xbf16, #tpu.memory_space<vmem>>, vector<1x20x20xbf16>
    %108 = vector.shape_cast %107 : vector<1x20x20xbf16> to vector<20x20xbf16>
    %cst_91 = arith.constant dense<0.000000e+00> : vector<64x20xf32>
    %109 = tpu.matmul %106, %108, %cst_91 {dimension_numbers = #tpu.dot_dimension_numbers<[1], [0], [0], [1], [0, 0, 1, 1], [], []>} : vector<64x20xbf16>, vector<20x20xbf16>, vector<64x20xf32> -> vector<64x20xf32>
    %110 = arith.addf %105, %109 : vector<64x20xf32>
    %111 = vector.extract_strided_slice %100 {offsets = [16, 0], sizes = [64, 20], strides = [1, 1]} : vector<80x20xbf16> to vector<64x20xbf16>
    %c6_92 = arith.constant 6 : index
    %c0_93 = arith.constant 0 : index
    %c0_94 = arith.constant 0 : index
    %112 = vector.load %arg4[%c6_92, %c0_93, %c0_94] : memref<9x20x20xbf16, #tpu.memory_space<vmem>>, vector<1x20x20xbf16>
    %113 = vector.shape_cast %112 : vector<1x20x20xbf16> to vector<20x20xbf16>
    %cst_95 = arith.constant dense<0.000000e+00> : vector<64x20xf32>
    %114 = tpu.matmul %111, %113, %cst_95 {dimension_numbers = #tpu.dot_dimension_numbers<[1], [0], [0], [1], [0, 0, 1, 1], [], []>} : vector<64x20xbf16>, vector<20x20xbf16>, vector<64x20xf32> -> vector<64x20xf32>
    %115 = arith.addf %110, %114 : vector<64x20xf32>
    %c0_96 = arith.constant 0 : index
    %c1_97 = arith.constant 1 : index
    %c0_98 = arith.constant 0 : index
    %116 = vector.load %arg8[%c0_96, %c1_97, %c0_98] : memref<10x10x20xf32, #tpu.memory_space<vmem>>, vector<10x8x20xf32>
    %117 = vector.shape_cast %116 : vector<10x8x20xf32> to vector<80x20xf32>
    %118 = arith.truncf %117 : vector<80x20xf32> to vector<80x20xbf16>
    %119 = vector.extract_strided_slice %118 {offsets = [0, 0], sizes = [64, 20], strides = [1, 1]} : vector<80x20xbf16> to vector<64x20xbf16>
    %c1_99 = arith.constant 1 : index
    %c0_100 = arith.constant 0 : index
    %c0_101 = arith.constant 0 : index
    %120 = vector.load %arg4[%c1_99, %c0_100, %c0_101] : memref<9x20x20xbf16, #tpu.memory_space<vmem>>, vector<1x20x20xbf16>
    %121 = vector.shape_cast %120 : vector<1x20x20xbf16> to vector<20x20xbf16>
    %cst_102 = arith.constant dense<0.000000e+00> : vector<64x20xf32>
    %122 = tpu.matmul %119, %121, %cst_102 {dimension_numbers = #tpu.dot_dimension_numbers<[1], [0], [0], [1], [0, 0, 1, 1], [], []>} : vector<64x20xbf16>, vector<20x20xbf16>, vector<64x20xf32> -> vector<64x20xf32>
    %123 = arith.addf %115, %122 : vector<64x20xf32>
    %124 = vector.extract_strided_slice %118 {offsets = [8, 0], sizes = [64, 20], strides = [1, 1]} : vector<80x20xbf16> to vector<64x20xbf16>
    %c4_103 = arith.constant 4 : index
    %c0_104 = arith.constant 0 : index
    %c0_105 = arith.constant 0 : index
    %125 = vector.load %arg4[%c4_103, %c0_104, %c0_105] : memref<9x20x20xbf16, #tpu.memory_space<vmem>>, vector<1x20x20xbf16>
    %126 = vector.shape_cast %125 : vector<1x20x20xbf16> to vector<20x20xbf16>
    %cst_106 = arith.constant dense<0.000000e+00> : vector<64x20xf32>
    %127 = tpu.matmul %124, %126, %cst_106 {dimension_numbers = #tpu.dot_dimension_numbers<[1], [0], [0], [1], [0, 0, 1, 1], [], []>} : vector<64x20xbf16>, vector<20x20xbf16>, vector<64x20xf32> -> vector<64x20xf32>
    %128 = arith.addf %123, %127 : vector<64x20xf32>
    %129 = vector.extract_strided_slice %118 {offsets = [16, 0], sizes = [64, 20], strides = [1, 1]} : vector<80x20xbf16> to vector<64x20xbf16>
    %c7_107 = arith.constant 7 : index
    %c0_108 = arith.constant 0 : index
    %c0_109 = arith.constant 0 : index
    %130 = vector.load %arg4[%c7_107, %c0_108, %c0_109] : memref<9x20x20xbf16, #tpu.memory_space<vmem>>, vector<1x20x20xbf16>
    %131 = vector.shape_cast %130 : vector<1x20x20xbf16> to vector<20x20xbf16>
    %cst_110 = arith.constant dense<0.000000e+00> : vector<64x20xf32>
    %132 = tpu.matmul %129, %131, %cst_110 {dimension_numbers = #tpu.dot_dimension_numbers<[1], [0], [0], [1], [0, 0, 1, 1], [], []>} : vector<64x20xbf16>, vector<20x20xbf16>, vector<64x20xf32> -> vector<64x20xf32>
    %133 = arith.addf %128, %132 : vector<64x20xf32>
    %c0_111 = arith.constant 0 : index
    %c2_112 = arith.constant 2 : index
    %c0_113 = arith.constant 0 : index
    %134 = vector.load %arg8[%c0_111, %c2_112, %c0_113] : memref<10x10x20xf32, #tpu.memory_space<vmem>>, vector<10x8x20xf32>
    %135 = vector.shape_cast %134 : vector<10x8x20xf32> to vector<80x20xf32>
    %136 = arith.truncf %135 : vector<80x20xf32> to vector<80x20xbf16>
    %137 = vector.extract_strided_slice %136 {offsets = [0, 0], sizes = [64, 20], strides = [1, 1]} : vector<80x20xbf16> to vector<64x20xbf16>
    %c2_114 = arith.constant 2 : index
    %c0_115 = arith.constant 0 : index
    %c0_116 = arith.constant 0 : index
    %138 = vector.load %arg4[%c2_114, %c0_115, %c0_116] : memref<9x20x20xbf16, #tpu.memory_space<vmem>>, vector<1x20x20xbf16>
    %139 = vector.shape_cast %138 : vector<1x20x20xbf16> to vector<20x20xbf16>
    %cst_117 = arith.constant dense<0.000000e+00> : vector<64x20xf32>
    %140 = tpu.matmul %137, %139, %cst_117 {dimension_numbers = #tpu.dot_dimension_numbers<[1], [0], [0], [1], [0, 0, 1, 1], [], []>} : vector<64x20xbf16>, vector<20x20xbf16>, vector<64x20xf32> -> vector<64x20xf32>
    %141 = arith.addf %133, %140 : vector<64x20xf32>
    %142 = vector.extract_strided_slice %136 {offsets = [8, 0], sizes = [64, 20], strides = [1, 1]} : vector<80x20xbf16> to vector<64x20xbf16>
    %c5_118 = arith.constant 5 : index
    %c0_119 = arith.constant 0 : index
    %c0_120 = arith.constant 0 : index
    %143 = vector.load %arg4[%c5_118, %c0_119, %c0_120] : memref<9x20x20xbf16, #tpu.memory_space<vmem>>, vector<1x20x20xbf16>
    %144 = vector.shape_cast %143 : vector<1x20x20xbf16> to vector<20x20xbf16>
    %cst_121 = arith.constant dense<0.000000e+00> : vector<64x20xf32>
    %145 = tpu.matmul %142, %144, %cst_121 {dimension_numbers = #tpu.dot_dimension_numbers<[1], [0], [0], [1], [0, 0, 1, 1], [], []>} : vector<64x20xbf16>, vector<20x20xbf16>, vector<64x20xf32> -> vector<64x20xf32>
    %146 = arith.addf %141, %145 : vector<64x20xf32>
    %147 = vector.extract_strided_slice %136 {offsets = [16, 0], sizes = [64, 20], strides = [1, 1]} : vector<80x20xbf16> to vector<64x20xbf16>
    %c8_122 = arith.constant 8 : index
    %c0_123 = arith.constant 0 : index
    %c0_124 = arith.constant 0 : index
    %148 = vector.load %arg4[%c8_122, %c0_123, %c0_124] : memref<9x20x20xbf16, #tpu.memory_space<vmem>>, vector<1x20x20xbf16>
    %149 = vector.shape_cast %148 : vector<1x20x20xbf16> to vector<20x20xbf16>
    %cst_125 = arith.constant dense<0.000000e+00> : vector<64x20xf32>
    %150 = tpu.matmul %147, %149, %cst_125 {dimension_numbers = #tpu.dot_dimension_numbers<[1], [0], [0], [1], [0, 0, 1, 1], [], []>} : vector<64x20xbf16>, vector<20x20xbf16>, vector<64x20xf32> -> vector<64x20xf32>
    %151 = arith.addf %146, %150 : vector<64x20xf32>
    %c0_126 = arith.constant 0 : index
    %c0_127 = arith.constant 0 : index
    %152 = vector.load %arg5[%c0_126, %c0_127] : memref<1x20xf32, #tpu.memory_space<vmem>>, vector<1x20xf32>
    %153 = vector.broadcast %152 : vector<1x20xf32> to vector<64x20xf32>
    %154 = arith.addf %151, %153 : vector<64x20xf32>
    %cst_128 = arith.constant 0.000000e+00 : f32
    %155 = vector.broadcast %cst_128 : f32 to vector<64x20xf32>
    %156 = arith.maximumf %154, %155 : vector<64x20xf32>
    %157 = vector.shape_cast %1 : vector<8x8x20xf32> to vector<64x20xf32>
    %158 = arith.addf %156, %157 : vector<64x20xf32>
    %cst_129 = arith.constant 0.000000e+00 : f32
    %159 = vector.broadcast %cst_129 : f32 to vector<64x20xf32>
    %160 = arith.maximumf %158, %159 : vector<64x20xf32>
    %161 = vector.shape_cast %160 : vector<64x20xf32> to vector<1x8x8x20xf32>
    %c0_130 = arith.constant 0 : index
    %c0_131 = arith.constant 0 : index
    %c0_132 = arith.constant 0 : index
    %c0_133 = arith.constant 0 : index
    %162 = vector.load %arg6[%c0_130, %c0_131, %c0_132, %c0_133] : memref<1x8x8x20xf32, #tpu.memory_space<vmem>>, vector<1x8x8x20xf32>
    tpu.vector_store %arg6[%c0_130, %c0_131, %c0_132, %c0_133], %161 {strides = array<i32>} : memref<1x8x8x20xf32, #tpu.memory_space<vmem>>, vector<1x8x8x20xf32>,
    return
  }
  func.func @transform_0(%arg0: i32) -> (i32, i32, i32, i32) {
    %c0_i32 = arith.constant 0 : i32
    %c0_i32_0 = arith.constant 0 : i32
    %c0_i32_1 = arith.constant 0 : i32
    %c0_i32_2 = arith.constant 0 : i32
    return %arg0, %c0_i32, %c0_i32_0, %c0_i32_1 : i32, i32, i32, i32
  }
  func.func @transform_1(%arg0: i32) -> (i32, i32, i32) {
    %c0_i32 = arith.constant 0 : i32
    %c0_i32_0 = arith.constant 0 : i32
    %c0_i32_1 = arith.constant 0 : i32
    %c0_i32_2 = arith.constant 0 : i32
    return %c0_i32, %c0_i32_0, %c0_i32_1 : i32, i32, i32
  }
  func.func @transform_2(%arg0: i32) -> (i32, i32) {
    %c0_i32 = arith.constant 0 : i32
    %c0_i32_0 = arith.constant 0 : i32
    %c0_i32_1 = arith.constant 0 : i32
    return %c0_i32, %c0_i32_0 : i32, i32
  }
  func.func @transform_3(%arg0: i32) -> (i32, i32, i32) {
    %c0_i32 = arith.constant 0 : i32
    %c0_i32_0 = arith.constant 0 : i32
    %c0_i32_1 = arith.constant 0 : i32
    %c0_i32_2 = arith.constant 0 : i32
    return %c0_i32, %c0_i32_0, %c0_i32_1 : i32, i32, i32
  }
  func.func @transform_4(%arg0: i32) -> (i32, i32) {
    %c0_i32 = arith.constant 0 : i32
    %c0_i32_0 = arith.constant 0 : i32
    %c0_i32_1 = arith.constant 0 : i32
    return %c0_i32, %c0_i32_0 : i32, i32
  }
  func.func @transform_5(%arg0: i32) -> (i32, i32, i32, i32) {
    %c0_i32 = arith.constant 0 : i32
    %c0_i32_0 = arith.constant 0 : i32
    %c0_i32_1 = arith.constant 0 : i32
    %c0_i32_2 = arith.constant 0 : i32
    return %arg0, %c0_i32, %c0_i32_0, %c0_i32_1 : i32, i32, i32, i32
  }
}

</mosaic_0001>

<bundles_post_ra>
// kernel: tpu_custom_call.1
= control target key start
LH: loop header
LB: loop body
LE: loop exit
PB: predicated region body
PF: predicated region fallthrough
CT: control target
= control target key end

     0   :  { %10 = vsyncpa [#allocation5], 0  ;;  %s3824_s0 = inlined_call_operand.hbm [shape: f32[2,8,8,20], index: 0, kind: input, shape index: {}]   ;;  %s3825_s1 = inlined_call_operand.hbm [shape: bf16[9,20,20], index: 1, kind: input, shape index: {}]   ;;  %s3826_s2 = inlined_call_operand.vmem [shape: f32[1,20], index: 2, kind: input, shape index: {}]   ;;  %s3827_s3 = inlined_call_operand.hbm [shape: bf16[9,20,20], index: 3, kind: input, shape index: {}]   ;;  %s3828_s4 = inlined_call_operand.vmem [shape: f32[1,20], index: 4, kind: input, shape index: {}]   ;;  %s3829_s5 = inlined_call_operand.hbm [shape: f32[2,8,8,20], index: 5, kind: output, shape index: {}]  }
   0x1   :  { %12 = vsyncpa [#allocation5 + $0x1], 0 }
   0x2   :  { %13 = vsyncpa [#allocation8], 0 }
   0x3   :  { %14 = vsyncpa [#allocation6], 0 }
   0x4   :  { %16 = vsyncpa [#allocation6 + $0x1], 0  ;;  %s3335_s18 = smov 0   ;;  %s3337_s19 = smov 0  }
   0x5   :  { %s3339_s20 = smov 0   ;;  %s3341_s21 = smov 0  }
   0x6 LB: > { %s3356_s22 = sadd.s32 4294967295, %s3292_s21   ;;  %s2426_s23 = sadd.s32 4294967294, %s3292_s21   ;;  %s3292_s21 = sphi %s3341_s21, %s3849_s21   ;;  %s3288_s20 = sphi %s3339_s20, %s3848_s20   ;;  %s3284_s19 = sphi %s3337_s19, %s3847_s19   ;;  %s3280_s18 = sphi %s3335_s18, %s3846_s18  }
   0x7   : > { %p42_p0 = scmp.ne.s32.totalorder %s3284_s19, %s3280_s18  ;;  %p3830_p1 = scmp.eq.s32.totalorder %s3356_s22, 0 }
   0x8   : > { %p156_p3 = scmp.eq.s32.totalorder %s2426_s23, 1  ;;  %p2427_p5 = scmp.ge.s32.totalorder %s3292_s21, 1 }
   0x9   : > { %p3365_p4 = por %p3830_p1, %p42_p0  ;;  %p163_p7 = scmp.lt.s32.totalorder %s3292_s21, 3 }
   0xa   : > { %p3370_p6 = por %p156_p3, %p42_p0  ;;  %s3294_s27 = smov [#allocation7]  }
   0xb   : > { %s3833_s24 = scalar_select %p3365_p4, 1, 0 }
   0xc   : > { %s3834_s25 = scalar_select %p3370_p6, 1, 0 }
   0xd   : > { %p3375_p8 = pnand %p2427_p5, %p163_p7  ;;  %s175_s28 = sshll.u32 %s3294_s27, 4  ;;  %s3379_s28 = int_to_ptr.vmem [resolvable:$true] %s175_s28 }
   0xe   : > { %s3295_s30 = smov [#allocation9]   ;;  %s3136_s9 = scalar_lea.hbm %s3825_s1, 1728 }
   0xf   : > { %p3038_p9 = pneg %p3375_p8  ;;  %s191_s6 = sshll.u32 %s3295_s30, 4  ;;  %s3390_s6 = int_to_ptr.vmem [resolvable:$true] %s191_s6 }
  0x10   : > { %p3137_p12 = scmp.ne.s32.totalorder %s3825_s1, %s3136_s9  ;;  %p3143_p5 = scmp.lt.u32.totalorder %s3136_s9, %s3825_s1 }
  0x11   : > { %p3386_p11 = pnand %p3038_p9, %p3830_p1 }
  0x13   : > { %p3138_p13 = pneg %p3386_p11 }
  0x15   : > { %p3139_p0 = pnand %p3138_p13, %p3137_p12 }
  0x17   : > { %p3140_p3 = pneg %p3139_p0 }
  0x19   : > { %p3145_p7 = pnand %p3143_p5, %p3140_p3 }
  0x1b   : > { %3148 = shalt.err (!%p3145_p7)
}
  0x1c   : > { %s3149_s14 = scalar_lea.vmem %s3379_s28, 1728  ;;  %p3157_p2 = scmp.lt.s32.totalorder %s3379_s28, %s3379_s28 }
  0x1d   : > { %p3150_p9 = scmp.ne.s32.totalorder %s3379_s28, %s3149_s14  ;;  %p3158_p12 = scmp.lt.s32.totalorder %s3149_s14, %s3149_s14 }
  0x1f   : > { %p3152_p10 = pnand %p3150_p9, %p3138_p13  ;;  %p3159_p0 = por %p3158_p12, %p3157_p2 }
  0x21   : > { %p3153_p1 = pneg %p3152_p10 }
  0x23   : > { %p3160_p6 = pnand %p3159_p0, %p3153_p1 }
  0x25   : > { %3163 = shalt.err (!%p3160_p6)
}
  0x26   : > { %s3296_s15 = smov 64   ;;  %s3297_s16 = smov 4  }
  0x27   : > { %3041 = dma.hbm_to_vmem [thread:$0]  (!%p3386_p11), %s3825_s1, 1728, %s3379_s28, [#allocation8], %s3296_s15, %s3296_s15, %s3297_s16  }
  0x28   : > { %s3164_s7 = scalar_lea.hbm %s3827_s3, 1728 }
  0x29   : > { %p3165_p2 = scmp.ne.s32.totalorder %s3827_s3, %s3164_s7  ;;  %p3171_p10 = scmp.lt.u32.totalorder %s3164_s7, %s3827_s3 }
  0x2b   : > { %p3167_p1 = pnand %p3165_p2, %p3138_p13 }
  0x2d   : > { %p3168_p6 = pneg %p3167_p1 }
  0x2f   : > { %p3173_p3 = pnand %p3171_p10, %p3168_p6 }
  0x31   : > { %3176 = shalt.err (!%p3173_p3)
}
  0x32   : > { %s3177_s28 = scalar_lea.vmem %s3390_s6, 1728  ;;  %p3185_p12 = scmp.lt.s32.totalorder %s3390_s6, %s3390_s6 }
  0x33   : > { %p3178_p5 = scmp.ne.s32.totalorder %s3390_s6, %s3177_s28  ;;  %p3186_p0 = scmp.lt.s32.totalorder %s3177_s28, %s3177_s28 }
  0x35   : > { %p3180_p7 = pnand %p3178_p5, %p3138_p13  ;;  %p3187_p2 = por %p3186_p0, %p3185_p12 }
  0x37   : > { %p3181_p9 = pneg %p3180_p7 }
  0x39   : > { %p3188_p1 = pnand %p3187_p2, %p3181_p9 }
  0x3b   : > { %3191 = shalt.err (!%p3188_p1)
}
  0x3c   : > { %3044 = dma.hbm_to_vmem [thread:$0]  (!%p3386_p11), %s3827_s3, 1728, %s3390_s6, [#allocation8], %s3296_s15, %s3296_s15, %s3297_s16  }
  0x3d   : > { %s3445_s14 = sadd.s32 1, %s3292_s21   ;;  %s29_s29 = sadd.s32 1, %s3288_s20 }
  0x3e   : > { %s26_s17 = ssub.s32 %s3292_s21, %s3445_s14  ;;  %p36_p13 = scmp.ne.s32.totalorder %s3288_s20, %s3284_s19 }
  0x3f   : > { %p27_p6 = scmp.eq.s32.totalorder %s26_s17, 0  ;;  %p37_p10 = scmp.eq.s32.totalorder %s3292_s21, 0 }
  0x40   : > { %p3837_p3 = scmp.eq.s32.totalorder %s3356_s22, 1  ;;  %p3055_p7 = scmp.lt.s32.totalorder %s3292_s21, 2 }
  0x41   : > { %s3461_s27 = scalar_select %p27_p6, %s3288_s20, %s29_s29  }
  0x42   : > { %p3455_p5 = por %p3837_p3, %p36_p13  ;;  %p38_p9 = por %p37_p10, %p36_p13 }
  0x43   : > { %s208_s30 = sand.u32 1, %s3288_s20   ;;  %s2554_s6 = sshll.u32 %s3292_s21, 10 }
  0x44   : > { %s3838_s23 = scalar_select %p3455_p5, 1, 0 }
  0x45   : > { %s2431_s7 = sshll.u32 %s208_s30, 6  ;;  %s3468_s8 = scalar_lea.hbm %s3824_s0, %s2554_s6 }
  0x46   : > { %s212_s9 = scalar_lea.vmem [#allocation4], %s2431_s7  ;;  %p3472_p11 = pnand %p3055_p7, %p38_p9 }
  0x47   : > { %s219_s10 = sshll.u32 %s212_s9, 4  ;;  %s3476_s28 = scalar_lea.sflag [#allocation5], %s208_s30  ;;  %s3470_s10 = int_to_ptr.vmem [resolvable:$true] %s219_s10 }
  0x48   : > { %s3192_s12 = scalar_lea.hbm %s3468_s8, 1024  ;;  %p3194_p0 = pneg %p3472_p11 }
  0x49   : > { %p3193_p12 = scmp.ne.s32.totalorder %s3468_s8, %s3192_s12  ;;  %s3197_s17 = scalar_lea.hbm %s3824_s0, 2048 }
  0x4a   : > { %p3198_p13 = scmp.lt.u32.totalorder %s3468_s8, %s3824_s0  ;;  %p3199_p6 = scmp.lt.u32.totalorder %s3197_s17, %s3192_s12 }
  0x4b   : > { %p3195_p2 = pnand %p3194_p0, %p3193_p12  ;;  %p3201_p3 = scmp.lt.u32.totalorder %s3192_s12, %s3468_s8 }
  0x4c   : > { %p3200_p10 = por %p3199_p6, %p3198_p13 }
  0x4d   : > { %p3196_p1 = pneg %p3195_p2 }
  0x4e   : > { %p3202_p7 = por %p3201_p3, %p3200_p10 }
  0x50   : > { %p3203_p9 = pnand %p3202_p7, %p3196_p1 }
  0x52   : > { %3206 = shalt.err (!%p3203_p9)
}
  0x53   : > { %s3207_s30 = scalar_lea.vmem %s3470_s10, 1024  ;;  %s3298_s15 = smov [#allocation4]  }
  0x54   : > { %p3208_p12 = scmp.ne.s32.totalorder %s3470_s10, %s3207_s30  ;;  %s3212_s16 = sshll.u32 %s3298_s15, 4  ;;  %s3213_s16 = int_to_ptr.vmem [resolvable:$false] %s3212_s16 }
  0x55   : > { %s3214_s9 = scalar_lea.vmem %s3213_s16, 2048  ;;  %p3215_p4 = scmp.lt.s32.totalorder %s3470_s10, %s3213_s16 }
  0x56   : > { %p3210_p2 = pnand %p3208_p12, %p3194_p0  ;;  %p3216_p13 = scmp.lt.s32.totalorder %s3214_s9, %s3207_s30 }
  0x58   : > { %p3211_p5 = pneg %p3210_p2  ;;  %p3217_p6 = por %p3216_p13, %p3215_p4 }
  0x5a   : > { %p3218_p10 = pnand %p3217_p6, %p3211_p5 }
  0x5c   : > { %3221 = shalt.err (!%p3218_p10)
}
  0x5d   : > { %s3299_s12 = smov 128   ;;  %s3300_s13 = smov 8  }
  0x5e   : > { %3048 = dma.hbm_to_vmem [thread:$0]  (!%p3472_p11), %s3468_s8, 1024, %s3470_s10, %s3476_s28, %s3299_s12, %s3299_s12, %s3300_s13  }
  0x5f   : > { %231 = sbr.rel (%p3375_p8) target bundleno = 882 (0x372), region = 40  ;;  %s3507_s29 = sand.u32 (!%p3375_p8), 1, %s3284_s19  }
  0x60   : > { %s2435_s17 = sshll.u32 (!%p3375_p8), %s3507_s29, 6  ;;  %s234_s7 = scalar_lea.sflag (!%p3375_p8), [#allocation5], %s3507_s29 }
  0x61   : > { %s3513_s6 = scalar_lea.vmem (!%p3375_p8), [#allocation4], %s2435_s17  ;;  %p3840_p4 = scmp.ne.s32.totalorder (!%p3375_p8), %s3833_s24, 0 }
  0x66   : > { %3267 = dma.done.wait (%p3840_p4), %s234_s7, 1024  }
  0x67   : > { %3269 = vsyncadd (%p3840_p4), %s234_s7, 4294966272  ;;  %p3841_p5 = scmp.eq.s32.totalorder %s3356_s22, 0 }
  0x69   : > { %3271 = dma.done.wait (%p3841_p5), [#allocation8], 3456   ;;  %p3842_p8 = pmov %p3841_p5 }
  0x6a   : > { %vm281_vm0 = vcmask 162816   ;;  %vm289_vm1 = vcmask 155648   ;;  %v3301_v0 = vmov 0.0   ;;  %vm283_vm2 = vcmask 156672   ;;  %v3100_v1 = vld [vmem:[#allocation7 + $0x24] sm:$0xff]   ;;  %v3566_v5 = vld [vmem:[%s3513_s6 + $0x10] sm:$0xff] }
  0x6b   : > { %3273 = vsyncadd (%p3842_p8), [#allocation8], 4294963840  ;;  %282 = vst.msk [vmem:[#allocation2] sm:$0xff] %vm281_vm0, %v3301_v0  ;;  %vm372_vm3 = vcmask 1041408   ;;  %v3560_v3 = vld [vmem:[%s3513_s6] sm:$0xff]  ;;  %2664 = vmatprep.subr.bf16.mxu0 %v3100_v1  ;;  %v3563_v4 = vld [vmem:[%s3513_s6 + $0x8] sm:$0xff] }
  0x6c   : > { %290 = vst.msk [vmem:[#allocation2 + $0x10] sm:$0x1] %vm289_vm1, %v3301_v0  ;;  %291 = vst.msk [vmem:[#allocation2 + $0x20] sm:$0x1] %vm289_vm1, %v3301_v0  ;;  %2665 = vmatpush3.bf16.msra.mxu0 %v3100_v1  ;;  %v3102_v6 = vld [vmem:[#allocation7] sm:$0xff]   ;;  %v3577_v8 = vld [vmem:[%s3513_s6 + $0x18] sm:$0xff] }
  0x6d   : > { %292 = vst.msk [vmem:[#allocation2 + $0x30] sm:$0x1] %vm289_vm1, %v3301_v0  ;;  %293 = vst.msk [vmem:[#allocation2 + $0x40] sm:$0x1] %vm289_vm1, %v3301_v0  ;;  %v3580_v9 = vld [vmem:[%s3513_s6 + $0x20] sm:$0xff]  ;;  %v3583_v10 = vld [vmem:[%s3513_s6 + $0x28] sm:$0xff] }
  0x6e   : > { %286 = vst.msk [vmem:[#allocation2 + $0x90] sm:$0xff] %vm281_vm0, %v3301_v0  ;;  %1291 = vst.msk [vmem:[#allocation3] sm:$0xff] %vm281_vm0, %v3301_v0  ;;  %v3101_v2 = vld [vmem:[#allocation7 + $0x2c] ss:$0 sps:$4 sm:$0x33]   ;;  %v3590_v11 = vld [vmem:[%s3513_s6 + $0x30] sm:$0xff] }
  0x6f   : > { %294 = vst.msk [vmem:[#allocation2 + $0x50] sm:$0x1] %vm289_vm1, %v3301_v0  ;;  %295 = vst.msk [vmem:[#allocation2 + $0x60] sm:$0x1] %vm289_vm1, %v3301_v0  ;;  %3008 = vmatprep.subr.msk.bf16.mxu0 %vm372_vm3, %v3101_v2  ;;  %v374_v7 = vsel %vm372_vm3, %v3101_v2, 0  ;;  %v3597_v12 = vld [vmem:[%s3513_s6 + $0x38] sm:$0xff] }
  0x70   : > { %296 = vst.msk [vmem:[#allocation2 + $0x70] sm:$0x1] %vm289_vm1, %v3301_v0  ;;  %297 = vst.msk [vmem:[#allocation2 + $0x80] sm:$0x1] %vm289_vm1, %v3301_v0  ;;  %2667 = vmatpush3.bf16.msra.mxu0 %v374_v7  ;;  %vm341_vm4 = vcmask 1043456   ;;  %v3104_v38 = vld [vmem:[#allocation7 + $0x48] sm:$0xff]  }
  0x71   : > { %298 = vst.msk [vmem:[#allocation2 + $0x19] sm:$0x1] %vm289_vm1, %v3301_v0  ;;  %299 = vst.msk [vmem:[#allocation2 + $0x29] sm:$0x1] %vm289_vm1, %v3301_v0  ;;  %2676 = vmatprep.subr.bf16.mxu0 %v3102_v6  ;;  %v3106_v42 = vld [vmem:[#allocation7 + $0xc] sm:$0xff]   ;;  %v3110_v61 = vld [vmem:[#allocation7 + $0x54] sm:$0xff]  }
  0x72   : > { %300 = vst.msk [vmem:[#allocation2 + $0x39] sm:$0x1] %vm289_vm1, %v3301_v0  ;;  %301 = vst.msk [vmem:[#allocation2 + $0x49] sm:$0x1] %vm289_vm1, %v3301_v0  ;;  %v314_v13 = vld [vmem:[#allocation2] sm:$0xff]  ;;  %v3108_v47 = vld [vmem:[#allocation7 + $0x30] sm:$0xff]  }
  0x73   : > { %302 = vst.msk [vmem:[#allocation2 + $0x59] sm:$0x1] %vm289_vm1, %v3301_v0  ;;  %303 = vst.msk [vmem:[#allocation2 + $0x69] sm:$0x1] %vm289_vm1, %v3301_v0  ;;  %s3751_s11 = scalar_lea.vmem [#allocation10], %s2435_s17  ;;  %s2555_s28 = sshll.u32 %s3356_s22, 10 }
  0x74   : > { %304 = vst.msk [vmem:[#allocation2 + $0x79] sm:$0x1] %vm289_vm1, %v3301_v0  ;;  %305 = vst.msk [vmem:[#allocation2 + $0x89] sm:$0x1] %vm289_vm1, %v3301_v0  ;;  %s2334_s30 = sshll.u32 %s3751_s11, 4  ;;  %s3772_s9 = scalar_lea.hbm %s3829_s5, %s2555_s28  ;;  %s3774_s30 = int_to_ptr.vmem [resolvable:$true] %s2334_s30 }
  0x75   : > { %1294 = vst.msk [vmem:[#allocation3 + $0x90] sm:$0xff] %vm281_vm0, %v3301_v0  ;;  %306 = vst.msk [vmem:[#allocation2 + $0x11] sm:$0xff] %vm281_vm0, %v3560_v3  ;;  %v323_v19 = vld [vmem:[#allocation2 + $0x90] sm:$0xff]  ;;  %v3103_v31 = vld [vmem:[#allocation7 + $0x8] ss:$0 sps:$4 sm:$0x33]  }
  0x76   : > { %1297 = vst.msk [vmem:[#allocation3 + $0x10] sm:$0x1] %vm289_vm1, %v3301_v0  ;;  %1298 = vst.msk [vmem:[#allocation3 + $0x20] sm:$0x1] %vm289_vm1, %v3301_v0  ;;  %v463_v37 = vsel %vm372_vm3, %v3103_v31, 0  ;;  %s2321_s22 = scalar_lea.sflag [#allocation6], %s3507_s29 }
  0x77   : > { %1299 = vst.msk [vmem:[#allocation3 + $0x30] sm:$0x1] %vm289_vm1, %v3301_v0  ;;  %1300 = vst.msk [vmem:[#allocation3 + $0x40] sm:$0x1] %vm289_vm1, %v3301_v0  ;;  %s3222_s12 = scalar_lea.vmem %s3774_s30, 1024  ;;  %p3843_p0 = scmp.ne.s32.totalorder %s3838_s23, 0 }
  0x78   : > { %1301 = vst.msk [vmem:[#allocation3 + $0x50] sm:$0x1] %vm289_vm1, %v3301_v0  ;;  %1302 = vst.msk [vmem:[#allocation3 + $0x60] sm:$0x1] %vm289_vm1, %v3301_v0  ;;  %p3223_p11 = scmp.ne.s32.totalorder %s3774_s30, %s3222_s12  ;;  %s3302_s13 = smov [#allocation10]  }
  0x79   : > { %1303 = vst.msk [vmem:[#allocation3 + $0x70] sm:$0x1] %vm289_vm1, %v3301_v0  ;;  %1304 = vst.msk [vmem:[#allocation3 + $0x80] sm:$0x1] %vm289_vm1, %v3301_v0  ;;  %s3226_s17 = sshll.u32 %s3302_s13, 4  ;;  %s3227_s17 = int_to_ptr.vmem [resolvable:$false] %s3226_s17 }
  0x7a   : > { %1305 = vst.msk [vmem:[#allocation3 + $0x19] sm:$0x1] %vm289_vm1, %v3301_v0  ;;  %1306 = vst.msk [vmem:[#allocation3 + $0x29] sm:$0x1] %vm289_vm1, %v3301_v0  ;;  %p3224_p1 = pnand %p3223_p11, %p3843_p0  ;;  %s3228_s7 = scalar_lea.vmem %s3227_s17, 2048 }
  0x7b   : > { %1307 = vst.msk [vmem:[#allocation3 + $0x39] sm:$0x1] %vm289_vm1, %v3301_v0  ;;  %1308 = vst.msk [vmem:[#allocation3 + $0x49] sm:$0x1] %vm289_vm1, %v3301_v0  ;;  %p3229_p7 = scmp.lt.s32.totalorder %s3774_s30, %s3227_s17  ;;  %p3230_p9 = scmp.lt.s32.totalorder %s3228_s7, %s3222_s12 }
  0x7c   : > { %1309 = vst.msk [vmem:[#allocation3 + $0x59] sm:$0x1] %vm289_vm1, %v3301_v0  ;;  %1310 = vst.msk [vmem:[#allocation3 + $0x69] sm:$0x1] %vm289_vm1, %v3301_v0  ;;  %v315_v14 = vld [vmem:[#allocation2 + $0x10] sm:$0xff]  ;;  %p3225_p3 = pneg %p3224_p1 }
  0x7d   : > { %1311 = vst.msk [vmem:[#allocation3 + $0x79] sm:$0x1] %vm289_vm1, %v3301_v0  ;;  %1312 = vst.msk [vmem:[#allocation3 + $0x89] sm:$0x1] %vm289_vm1, %v3301_v0  ;;  %v324_v17 = vpack.c.bf16 %v315_v14, %v314_v13  ;;  %v623_v46 = vld [vmem:[#allocation2 + $0x11] sm:$0xff]  ;;  %p3231_p12 = por %p3230_p9, %p3229_p7 }
  0x7e   : > { %284 = vst.msk [vmem:[#allocation2 + $0x8] sm:$0x3] %vm283_vm2, %v3301_v0  ;;  %287 = vst.msk [vmem:[#allocation2 + $0x98] sm:$0x3] %vm283_vm2, %v3301_v0 }
  0x7f   : > { %1292 = vst.msk [vmem:[#allocation3 + $0x8] sm:$0x3] %vm283_vm2, %v3301_v0  ;;  %1295 = vst.msk [vmem:[#allocation3 + $0x98] sm:$0x3] %vm283_vm2, %v3301_v0  ;;  %v342_v20 = vrot.slane %v324_v17, 4  ;;  %p3232_p2 = pnand %p3231_p12, %p3225_p3 }
  0x80   : > { %307 = vst.msk [vmem:[#allocation2 + $0x21] sm:$0xff] %vm281_vm0, %v3563_v4  ;;  %308 = vst.msk [vmem:[#allocation2 + $0x31] sm:$0xff] %vm281_vm0, %v3566_v5  ;;  %v3105_v40 = vld [vmem:[#allocation7 + $0x50] ss:$0 sps:$4 sm:$0x33]  }
  0x81   : > { %309 = vst.msk [vmem:[#allocation2 + $0x41] sm:$0xff] %vm281_vm0, %v3577_v8  ;;  %310 = vst.msk [vmem:[#allocation2 + $0x51] sm:$0xff] %vm281_vm0, %v3580_v9  ;;  %v547_v41 = vsel %vm372_vm3, %v3105_v40, 0  ;;  %v3107_v43 = vld [vmem:[#allocation7 + $0x14] ss:$0 sps:$4 sm:$0x33]  }
  0x82   : > { %311 = vst.msk [vmem:[#allocation2 + $0x61] sm:$0xff] %vm281_vm0, %v3583_v10  ;;  %312 = vst.msk [vmem:[#allocation2 + $0x71] sm:$0xff] %vm281_vm0, %v3590_v11  ;;  %v663_v44 = vsel %vm372_vm3, %v3107_v43, 0  ;;  %v3109_v55 = vld [vmem:[#allocation7 + $0x38] ss:$0 sps:$4 sm:$0x33]  }
  0x83   : > { %313 = vst.msk [vmem:[#allocation2 + $0x81] sm:$0xff] %vm281_vm0, %v3597_v12  ;;  %v778_v58 = vsel %vm372_vm3, %v3109_v55, 0 }
  0x85   : > { %v622_v45 = vld [vmem:[#allocation2 + $0x1] sm:$0xff] }
  0x86   : > { %v632_v48 = vpack.c.bf16 %v623_v46, %v622_v45 }
  0x87   : > { %v316_v15 = vld [vmem:[#allocation2 + $0x20] sm:$0xff]  ;;  %v317_v16 = vld [vmem:[#allocation2 + $0x30] sm:$0xff] }
  0x88   : > { %v325_v18 = vpack.c.bf16 %v317_v16, %v316_v15  ;;  %v318_v21 = vld [vmem:[#allocation2 + $0x40] sm:$0xff]  ;;  %v319_v22 = vld [vmem:[#allocation2 + $0x50] sm:$0xff]  ;;  %v747_v59 = vrot.slane %v632_v48, 4  ;;  %v3111_v15 = vld [vmem:[#allocation7 + $0x5c] ss:$0 sps:$4 sm:$0x33]  }
  0x89   : > { %v320_v23 = vld [vmem:[#allocation2 + $0x60] sm:$0xff]  ;;  %v326_v25 = vpack.c.bf16 %v319_v22, %v318_v21  ;;  %v321_v26 = vld [vmem:[#allocation2 + $0x70] sm:$0xff] }
  0x8a   : > { %v343_v24 = vrot.slane %v325_v18, 4  ;;  %v327_v27 = vpack.c.bf16 %v321_v26, %v320_v23  ;;  %v322_v28 = vld [vmem:[#allocation2 + $0x80] sm:$0xff]  ;;  %v625_v50 = vld [vmem:[#allocation2 + $0x31] sm:$0xff] }
  0x8b   : > { %v345_v30 = vrot.slane %v326_v25, 4  ;;  %v328_v32 = vpack.c.bf16 %v323_v19, %v322_v28  ;;  %v624_v49 = vld [vmem:[#allocation2 + $0x21] sm:$0xff]  ;;  %v627_v52 = vld [vmem:[#allocation2 + $0x51] sm:$0xff] }
  0x8c   : > { %v344_v29 = vsel %vm341_vm4, %v342_v20, %v343_v24  ;;  %v347_v33 = vrot.slane %v327_v27, 4  ;;  %v626_v51 = vld [vmem:[#allocation2 + $0x41] sm:$0xff]  ;;  %v633_v53 = vpack.c.bf16 %v625_v50, %v624_v49  ;;  %v629_v57 = vld [vmem:[#allocation2 + $0x71] sm:$0xff]  ;;  %v3113_v20 = vld [vmem:[#allocation7 + $0x20] ss:$0 sps:$4 sm:$0x33]  }
  0x8d   : > { %2668 = vmatprep.mubr.msk.bf16.mxu0 %vm281_vm0, %v344_v29  ;;  %v346_v34 = vsel %vm341_vm4, %v343_v24, %v345_v30  ;;  %v349_v36 = vrot.slane %v328_v32, 4  ;;  %v634_v54 = vpack.c.bf16 %v627_v52, %v626_v51  ;;  %v628_v56 = vld [vmem:[#allocation2 + $0x61] sm:$0xff]  ;;  %v986_v21 = vsel %vm372_vm3, %v3113_v20, 0  ;;  %v946_v23 = vld [vmem:[#allocation2 + $0x12] sm:$0xff] }
  0x8e   : > { %2669 = vmatmul.mubr.msk.bf16.vlgmr.msra.gmra.mrb[0].mxu0 %vm281_vm0, %v346_v34  ;;  %v348_v35 = vsel %vm341_vm4, %v345_v30, %v347_v33  ;;  %v748_v60 = vrot.slane %v633_v53, 4  ;;  %v635_v62 = vpack.c.bf16 %v629_v57, %v628_v56  ;;  %v630_v2 = vld [vmem:[#allocation2 + $0x81] sm:$0xff]  ;;  %v950_v29 = vld [vmem:[#allocation2 + $0x52] sm:$0xff]  ;;  %v2493_v56 = vld [vmem:[%s3826_s2] ss:$0 sm:$0xff] }
  0x8f   : > { %2677 = vmatpush3.bf16.msra.mxu0 %v3102_v6  ;;  %2672 = vmatprep.mubr.msk.bf16.mxu0 %vm281_vm0, %v348_v35  ;;  %v350_v39 = vsel %vm341_vm4, %v347_v33, %v349_v36  ;;  %v750_v0 = vrot.slane %v634_v54, 4  ;;  %v631_v6 = vld [vmem:[#allocation2 + $0x91] sm:$0xff]  ;;  %v945_v22 = vld [vmem:[#allocation2 + $0x2] sm:$0xff] }
  0x90   : > { %3009 = vmatprep.subr.msk.bf16.mxu0 %vm372_vm3, %v3103_v31  ;;  %v749_v63 = vsel %vm341_vm4, %v747_v59, %v748_v60  ;;  %v752_v1 = vrot.slane %v635_v62, 4  ;;  %v636_v13 = vpack.c.bf16 %v631_v6, %v630_v2  ;;  %v3114_v24 = vld [vmem:[#allocation7 + $0x3c] sm:$0xff]   ;;  %v952_v34 = vld [vmem:[#allocation2 + $0x72] sm:$0xff] }
  0x91   : > { %v751_v7 = vsel %vm341_vm4, %v748_v60, %v750_v0  ;;  %v947_v26 = vld [vmem:[#allocation2 + $0x22] sm:$0xff]  ;;  %v3118_v52 = vld [vmem:[#allocation9 + $0x24] sm:$0xff]  }
  0x92   : > { %v753_v14 = vsel %vm341_vm4, %v750_v0, %v752_v1  ;;  %v754_v16 = vrot.slane %v636_v13, 4  ;;  %v949_v28 = vld [vmem:[#allocation2 + $0x42] sm:$0xff]  ;;  %2772 = vmatprep.subr.bf16.mxu1 %v3118_v52 }
  0x93   : > { %2679 = vmatpush3.bf16.msra.mxu0 %v463_v37  ;;  %v957_v31 = vpack.c.bf16 %v950_v29, %v949_v28  ;;  %v951_v33 = vld [vmem:[#allocation2 + $0x62] sm:$0xff]  ;;  %2773 = vmatpush3.bf16.msra.mxu1 %v3118_v52  ;;  %v3123_v52 = vld [vmem:[#allocation9 + $0x50] ss:$0 sps:$4 sm:$0x33]  }
  0x94   : > { %2688 = vmatprep.subr.bf16.mxu0 %v3104_v38  ;;  %v755_v19 = vsel %vm341_vm4, %v752_v1, %v754_v16 }
  0x96   : > { %2673 = vmatmul.mubr.msk.bf16.gmra.mrb[4].mxu0 %vm281_vm0, %v350_v39  ;;  %v958_v39 = vpack.c.bf16 %v952_v34, %v951_v33 }
  0x97   : > { %2680 = vmatprep.mubr.msk.bf16.mxu0 %vm281_vm0, %v324_v17  ;;  %v870_v17 = vsel %vm372_vm3, %v3111_v15, 0 }
  0x9e   : > { %2681 = vmatmul.mubr.msk.bf16.vlgmr.msra.gmra.mrb[0].mxu0 %vm281_vm0, %v325_v18 }
  0x9f   : > { %2689 = vmatpush3.bf16.msra.mxu0 %v3104_v38  ;;  %2684 = vmatprep.mubr.msk.bf16.mxu0 %vm281_vm0, %v326_v25  ;;  %v3116_v38 = vld [vmem:[#allocation7 + $0x60] sm:$0xff]  }
  0xa0   : > { %3010 = vmatprep.subr.msk.bf16.mxu0 %vm372_vm3, %v3105_v40 }
  0xa3   : > { %2691 = vmatpush3.bf16.msra.mxu0 %v547_v41  ;;  %v1073_v41 = vrot.slane %v957_v31, 4 }
  0xa4   : > { %2700 = vmatprep.subr.bf16.mxu0 %v3106_v42 }
  0xa6   : > { %2685 = vmatmul.mubr.msk.bf16.gmra.mrb[4].mxu0 %vm281_vm0, %v327_v27 }
  0xa7   : > { %2692 = vmatprep.mubr.msk.bf16.mxu0 %vm281_vm0, %v325_v18  ;;  %v3112_v18 = vld [vmem:[#allocation7 + $0x18] sm:$0xff]  }
  0xae   : > { %2693 = vmatmul.mubr.msk.bf16.vlgmr.msra.gmra.mrb[0].mxu0 %vm281_vm0, %v326_v25  ;;  %v955_v25 = vpack.c.bf16 %v946_v23, %v945_v22 }
  0xaf   : > { %2701 = vmatpush3.bf16.msra.mxu0 %v3106_v42  ;;  %2696 = vmatprep.mubr.msk.bf16.mxu0 %vm281_vm0, %v327_v27  ;;  %v948_v27 = vld [vmem:[#allocation2 + $0x32] sm:$0xff]  ;;  %v1075_v42 = vrot.slane %v958_v39, 4 }
  0xb0   : > { %3011 = vmatprep.subr.msk.bf16.mxu0 %vm372_vm3, %v3107_v43  ;;  %v956_v30 = vpack.c.bf16 %v948_v27, %v947_v26  ;;  %v1070_v36 = vrot.slane %v955_v25, 4  ;;  %v953_v43 = vld [vmem:[#allocation2 + $0x82] sm:$0xff] }
  0xb2   : > { %v1071_v37 = vrot.slane %v956_v30, 4 }
  0xb3   : > { %2703 = vmatpush3.bf16.msra.mxu0 %v663_v44  ;;  %v954_v44 = vld [vmem:[#allocation2 + $0x92] sm:$0xff] }
  0xb4   : > { %2712 = vmatprep.subr.bf16.mxu0 %v3108_v47  ;;  %v1072_v40 = vsel %vm341_vm4, %v1070_v36, %v1071_v37  ;;  %v1074_v45 = vsel %vm341_vm4, %v1071_v37, %v1073_v41  ;;  %v959_v46 = vpack.c.bf16 %v954_v44, %v953_v43  ;;  %v1330_v37 = vld [vmem:[#allocation3 + $0x90] sm:$0xff] }
  0xb5   : > { %v3121_v43 = vld [vmem:[#allocation9 + $0x8] ss:$0 sps:$4 sm:$0x33]  }
  0xb6   : > { %2697 = vmatmul.mubr.msk.bf16.gmra.mrb[4].mxu0 %vm281_vm0, %v328_v32  ;;  %v3115_v32 = vld [vmem:[#allocation7 + $0x44] ss:$0 sps:$4 sm:$0x33]   ;;  %v1077_v49 = vrot.slane %v959_v46, 4 }
  0xb7   : > { %2704 = vmatprep.mubr.msk.bf16.mxu0 %vm281_vm0, %v632_v48  ;;  %v1101_v35 = vsel %vm372_vm3, %v3115_v32, 0  ;;  %v3117_v48 = vld [vmem:[#allocation7 + $0x68] ss:$0 sps:$4 sm:$0x33]  }
  0xb8   : > { %v1193_v50 = vsel %vm372_vm3, %v3117_v48, 0  ;;  %v1078_v51 = vsel %vm341_vm4, %v1075_v42, %v1077_v49  ;;  %v3122_v49 = vld [vmem:[#allocation9 + $0x48] sm:$0xff]  }
  0xbe   : > { %2705 = vmatmul.mubr.msk.bf16.vlgmr.msra.gmra.mrb[0].mxu0 %vm281_vm0, %v633_v53 }
  0xbf   : > { %2713 = vmatpush3.bf16.msra.mxu0 %v3108_v47  ;;  %2708 = vmatprep.mubr.msk.bf16.mxu0 %vm281_vm0, %v634_v54  ;;  %v1076_v47 = vsel %vm341_vm4, %v1073_v41, %v1075_v42 }
  0xc0   : > { %3012 = vmatprep.subr.msk.bf16.mxu0 %vm372_vm3, %v3109_v55 }
  0xc3   : > { %2715 = vmatpush3.bf16.msra.mxu0 %v778_v58 }
  0xc4   : > { %2724 = vmatprep.subr.bf16.mxu0 %v3110_v61 }
  0xc6   : > { %2709 = vmatmul.mubr.msk.bf16.gmra.mrb[4].mxu0 %vm281_vm0, %v635_v62 }
  0xc7   : > { %2716 = vmatprep.mubr.msk.bf16.mxu0 %vm281_vm0, %v749_v63 }
  0xce   : > { %2717 = vmatmul.mubr.msk.bf16.vlgmr.msra.gmra.mrb[0].mxu0 %vm281_vm0, %v751_v7 }
  0xcf   : > { %2725 = vmatpush3.bf16.msra.mxu0 %v3110_v61  ;;  %2720 = vmatprep.mubr.msk.bf16.mxu0 %vm281_vm0, %v753_v14 }
  0xd0   : > { %3013 = vmatprep.subr.msk.bf16.mxu0 %vm372_vm3, %v3111_v15 }
  0xd3   : > { %2727 = vmatpush3.bf16.msra.mxu0 %v870_v17 }
  0xd4   : > { %2736 = vmatprep.subr.bf16.mxu0 %v3112_v18 }
  0xd6   : > { %2721 = vmatmul.mubr.msk.bf16.gmra.mrb[4].mxu0 %vm281_vm0, %v755_v19 }
  0xd7   : > { %2728 = vmatprep.mubr.msk.bf16.mxu0 %vm281_vm0, %v633_v53  ;;  %v3119_v53 = vld [vmem:[#allocation9 + $0x2c] ss:$0 sps:$4 sm:$0x33]  }
  0xd8   : > { %3017 = vmatprep.subr.msk.bf16.mxu1 %vm372_vm3, %v3119_v53  ;;  %v1379_v55 = vsel %vm372_vm3, %v3119_v53, 0  ;;  %v1552_v53 = vsel %vm372_vm3, %v3123_v52, 0 }
  0xd9   : > { %2775 = vmatpush3.bf16.msra.mxu1 %v1379_v55  ;;  %v3125_v55 = vld [vmem:[#allocation9 + $0x14] ss:$0 sps:$4 sm:$0x33]  }
  0xde   : > { %2729 = vmatmul.mubr.msk.bf16.vlgmr.msra.gmra.mrb[0].mxu0 %vm281_vm0, %v634_v54  ;;  %v3120_v54 = vld [vmem:[#allocation9] sm:$0xff]  }
  0xdf   : > { %2737 = vmatpush3.bf16.msra.mxu0 %v3112_v18  ;;  %2732 = vmatprep.mubr.msk.bf16.mxu0 %vm281_vm0, %v635_v62 }
  0xe0   : > { %3014 = vmatprep.subr.msk.bf16.mxu0 %vm372_vm3, %v3113_v20  ;;  %2784 = vmatprep.subr.bf16.mxu1 %v3120_v54 }
  0xe3   : > { %2739 = vmatpush3.bf16.msra.mxu0 %v986_v21  ;;  %v1321_v21 = vld [vmem:[#allocation3] sm:$0xff] }
  0xe4   : > { %2748 = vmatprep.subr.bf16.mxu0 %v3114_v24 }
  0xe6   : > { %2733 = vmatmul.mubr.msk.bf16.gmra.mrb[4].mxu0 %vm281_vm0, %v636_v13 }
  0xe7   : > { %2740 = vmatprep.mubr.msk.bf16.mxu0 %vm281_vm0, %v955_v25 }
  0xee   : > { %2741 = vmatmul.mubr.msk.bf16.vlgmr.msra.gmra.mrb[0].mxu0 %vm281_vm0, %v956_v30 }
  0xef   : > { %2749 = vmatpush3.bf16.msra.mxu0 %v3114_v24  ;;  %2744 = vmatprep.mubr.msk.bf16.mxu0 %vm281_vm0, %v957_v31 }
  0xf0   : > { %3015 = vmatprep.subr.msk.bf16.mxu0 %vm372_vm3, %v3115_v32 }
  0xf3   : > { %2751 = vmatpush3.bf16.msra.mxu0 %v1101_v35 }
  0xf4   : > { %2760 = vmatprep.subr.bf16.mxu0 %v3116_v38 }
  0xf6   : > { %2745 = vmatmul.mubr.msk.bf16.gmra.mrb[4].mxu0 %vm281_vm0, %v958_v39 }
  0xf7   : > { %2752 = vmatprep.mubr.msk.bf16.mxu0 %vm281_vm0, %v1072_v40 }
  0xfe   : > { %2753 = vmatmul.mubr.msk.bf16.vlgmr.msra.gmra.mrb[0].mxu0 %vm281_vm0, %v1074_v45 }
  0xff   : > { %2761 = vmatpush3.bf16.msra.mxu0 %v3116_v38  ;;  %2756 = vmatprep.mubr.msk.bf16.mxu0 %vm281_vm0, %v1076_v47 }
 0x100   : > { %3016 = vmatprep.subr.msk.bf16.mxu0 %vm372_vm3, %v3117_v48  ;;  %v1468_v48 = vsel %vm372_vm3, %v3121_v43, 0 }
 0x103   : > { %2763 = vmatpush3.bf16.msra.mxu0 %v1193_v50 }
 0x106   : > { %2757 = vmatmul.mubr.msk.bf16.gmra.mrb[4].mxu0 %vm281_vm0, %v1078_v51 }
 0x107   : > { %2764 = vmatprep.mubr.msk.bf16.mxu0 %vm281_vm0, %v956_v30 }
 0x10e   : > { %2765 = vmatmul.mubr.msk.bf16.vlgmr.msra.gmra.mrb[0].mxu0 %vm281_vm0, %v957_v31 }
 0x10f   : > { %2768 = vmatprep.mubr.msk.bf16.mxu0 %vm281_vm0, %v958_v39 }
 0x116   : > { %2769 = vmatmul.mubr.msk.bf16.gmra.mrb[4].mxu0 %vm281_vm0, %v959_v46 }
 0x1e1   : > { %v2766_v57 = vpop.f32.mrb[0].mxu0 }
 0x1e2   : > { %v1277_v58 = vadd.f32 %v2766_v57, %v2493_v56  ;;  %v1229_v59 = vpop.f32.mrb[1].mxu0  ;;  %v3126_v57 = vld [vmem:[#allocation9 + $0x30] sm:$0xff]  }
 0x1e3   : > { %v1275_v60 = vadd.f32 %v2493_v56, %v1229_v59  ;;  %v2767_v61 = vpop.f32.mrb[2].mxu0 }
 0x1e4   : > { %v1285_v62 = vmax.f32 %v1277_v58, 0.0  ;;  %v1278_v63 = vadd.f32 %v2767_v61, %v2493_v56  ;;  %v1232_v0 = vpop.f32.mrb[3].mxu0  ;;  %v1627_v58 = vld [vmem:[#allocation3 + $0x1] sm:$0xff] }
 0x1e5   : > { %v1283_v1 = vmax.f32 %v1275_v60, 0.0  ;;  %v1276_v2 = vadd.f32 %v2493_v56, %v1232_v0 }
 0x1e6   : > { %1315 = vst.msk [vmem:[#allocation3 + $0x31] sm:$0xff] %vm281_vm0, %v1285_v62  ;;  %v1286_v6 = vmax.f32 %v1278_v63, 0.0 }
 0x1e7   : > { %1313 = vst.msk [vmem:[#allocation3 + $0x11] sm:$0xff] %vm281_vm0, %v1283_v1  ;;  %v1284_v7 = vmax.f32 %v1276_v2, 0.0  ;;  %v3127_v2 = vld [vmem:[#allocation9 + $0x38] ss:$0 sps:$4 sm:$0x33]  }
 0x1e8   : > { %1316 = vst.msk [vmem:[#allocation3 + $0x41] sm:$0xff] %vm281_vm0, %v1286_v6 }
 0x1e9   : > { %1314 = vst.msk [vmem:[#allocation3 + $0x21] sm:$0xff] %vm281_vm0, %v1284_v7  ;;  %v2770_v13 = vpop.f32.mrb[4].mxu0  ;;  %v1783_v7 = vsel %vm372_vm3, %v3127_v2, 0 }
 0x1ea   : > { %v1281_v14 = vadd.f32 %v2770_v13, %v2493_v56  ;;  %v1245_v15 = vpop.f32.mrb[5].mxu0  ;;  %v3128_v13 = vld [vmem:[#allocation9 + $0x54] sm:$0xff]  }
 0x1eb   : > { %v1279_v16 = vadd.f32 %v2493_v56, %v1245_v15  ;;  %v2771_v17 = vpop.f32.mrb[6].mxu0 }
 0x1ec   : > { %v1289_v18 = vmax.f32 %v1281_v14, 0.0  ;;  %v1282_v19 = vadd.f32 %v2771_v17, %v2493_v56  ;;  %v1248_v20 = vpop.f32.mrb[7].mxu0 }
 0x1ed   : > { %v1287_v22 = vmax.f32 %v1279_v16, 0.0  ;;  %v1280_v23 = vadd.f32 %v2493_v56, %v1248_v20  ;;  %v1324_v29 = vld [vmem:[#allocation3 + $0x30] sm:$0xff]  ;;  %v1668_v56 = vsel %vm372_vm3, %v3125_v55, 0 }
 0x1ee   : > { %1319 = vst.msk [vmem:[#allocation3 + $0x71] sm:$0xff] %vm281_vm0, %v1289_v18  ;;  %v1290_v24 = vmax.f32 %v1282_v19, 0.0  ;;  %v1322_v25 = vld [vmem:[#allocation3 + $0x10] sm:$0xff] }
 0x1ef   : > { %1317 = vst.msk [vmem:[#allocation3 + $0x51] sm:$0xff] %vm281_vm0, %v1287_v22  ;;  %v1288_v26 = vmax.f32 %v1280_v23, 0.0  ;;  %v1331_v27 = vpack.c.bf16 %v1322_v25, %v1321_v21  ;;  %v1325_v34 = vld [vmem:[#allocation3 + $0x40] sm:$0xff]  ;;  %v1628_v59 = vld [vmem:[#allocation3 + $0x11] sm:$0xff] }
 0x1f0   : > { %1320 = vst.msk [vmem:[#allocation3 + $0x81] sm:$0xff] %vm281_vm0, %v1290_v24  ;;  %v1323_v28 = vld [vmem:[#allocation3 + $0x20] sm:$0xff]  ;;  %v1637_v60 = vpack.c.bf16 %v1628_v59, %v1627_v58  ;;  %v1630_v63 = vld [vmem:[#allocation3 + $0x31] sm:$0xff]  ;;  %v3129_v24 = vld [vmem:[#allocation9 + $0x5c] ss:$0 sps:$4 sm:$0x33]  }
 0x1f1   : > { %1318 = vst.msk [vmem:[#allocation3 + $0x61] sm:$0xff] %vm281_vm0, %v1288_v26  ;;  %v1332_v30 = vpack.c.bf16 %v1324_v29, %v1323_v28  ;;  %v1348_v31 = vrot.slane %v1331_v27, 4  ;;  %v1629_v61 = vld [vmem:[#allocation3 + $0x21] sm:$0xff]  ;;  %v1636_v23 = vld [vmem:[#allocation3 + $0x91] sm:$0xff]  ;;  %v1875_v28 = vsel %vm372_vm3, %v3129_v24, 0 }
 0x1f2   : > { %v1638_v0 = vpack.c.bf16 %v1630_v63, %v1629_v61  ;;  %v1631_v1 = vld [vmem:[#allocation3 + $0x41] sm:$0xff]  ;;  %v1752_v18 = vrot.slane %v1637_v60, 4 }
 0x1f3   : > { %v1349_v32 = vrot.slane %v1332_v30, 4  ;;  %v3130_v29 = vld [vmem:[#allocation9 + $0x18] sm:$0xff]  }
 0x1f4   : > { %v1753_v15 = vrot.slane %v1638_v0, 4 }
 0x1f5   : > { %v1350_v33 = vsel %vm341_vm4, %v1348_v31, %v1349_v32  ;;  %v1328_v39 = vld [vmem:[#allocation3 + $0x70] sm:$0xff] }
 0x1f6   : > { %2776 = vmatprep.mubr.msk.bf16.mxu1 %vm281_vm0, %v1350_v33  ;;  %v1326_v35 = vld [vmem:[#allocation3 + $0x50] sm:$0xff]  ;;  %v1754_v19 = vsel %vm341_vm4, %v1752_v18, %v1753_v15 }
 0x1f7   : > { %v1333_v36 = vpack.c.bf16 %v1326_v35, %v1325_v34  ;;  %v1329_v40 = vld [vmem:[#allocation3 + $0x80] sm:$0xff]  ;;  %v1632_v62 = vld [vmem:[#allocation3 + $0x51] sm:$0xff]  ;;  %v3132_v34 = vld [vmem:[#allocation9 + $0x3c] sm:$0xff]  }
 0x1f8   : > { %v1327_v38 = vld [vmem:[#allocation3 + $0x60] sm:$0xff]  ;;  %v1335_v46 = vpack.c.bf16 %v1330_v37, %v1329_v40  ;;  %v1639_v6 = vpack.c.bf16 %v1632_v62, %v1631_v1  ;;  %v1634_v16 = vld [vmem:[#allocation3 + $0x71] sm:$0xff] }
 0x1f9   : > { %v1351_v41 = vrot.slane %v1333_v36, 4  ;;  %v1334_v42 = vpack.c.bf16 %v1328_v39, %v1327_v38  ;;  %v1633_v14 = vld [vmem:[#allocation3 + $0x61] sm:$0xff]  ;;  %v1955_v39 = vld [vmem:[#allocation3 + $0x52] sm:$0xff] }
 0x1fa   : > { %v1355_v50 = vrot.slane %v1335_v46, 4  ;;  %v1640_v17 = vpack.c.bf16 %v1634_v16, %v1633_v14  ;;  %v1755_v20 = vrot.slane %v1639_v6, 4  ;;  %v1635_v22 = vld [vmem:[#allocation3 + $0x81] sm:$0xff]  ;;  %v1953_v40 = vld [vmem:[#allocation3 + $0x32] sm:$0xff] }
 0x1fb   : > { %v1352_v44 = vsel %vm341_vm4, %v1349_v32, %v1351_v41  ;;  %v1353_v45 = vrot.slane %v1334_v42, 4  ;;  %v1641_v26 = vpack.c.bf16 %v1636_v23, %v1635_v22  ;;  %v3131_v32 = vld [vmem:[#allocation9 + $0x20] ss:$0 sps:$4 sm:$0x33]   ;;  %v1950_v35 = vld [vmem:[#allocation3 + $0x2] sm:$0xff] }
 0x1fc   : > { %2777 = vmatmul.mubr.msk.bf16.vlgmr.msra.gmra.mrb[0].mxu1 %vm281_vm0, %v1352_v44  ;;  %v1757_v21 = vrot.slane %v1640_v17, 4  ;;  %v1756_v25 = vsel %vm341_vm4, %v1753_v15, %v1755_v20  ;;  %v1991_v33 = vsel %vm372_vm3, %v3131_v32, 0  ;;  %v1952_v38 = vld [vmem:[#allocation3 + $0x22] sm:$0xff] }
 0x1fd   : > { %2785 = vmatpush3.bf16.msra.mxu1 %v3120_v54  ;;  %v1354_v47 = vsel %vm341_vm4, %v1351_v41, %v1353_v45  ;;  %v1356_v51 = vsel %vm341_vm4, %v1353_v45, %v1355_v50  ;;  %v3124_v54 = vld [vmem:[#allocation9 + $0xc] sm:$0xff]   ;;  %v1961_v41 = vpack.c.bf16 %v1953_v40, %v1952_v38 }
 0x1fe   : > { %2780 = vmatprep.mubr.msk.bf16.mxu1 %vm281_vm0, %v1354_v47  ;;  %3018 = vmatprep.subr.msk.bf16.mxu1 %vm372_vm3, %v3121_v43  ;;  %v3133_v43 = vld [vmem:[#allocation9 + $0x44] ss:$0 sps:$4 sm:$0x33]   ;;  %v1956_v47 = vld [vmem:[#allocation3 + $0x62] sm:$0xff] }
 0x1ff   : > { %v2106_v45 = vsel %vm372_vm3, %v3133_v43, 0 }
 0x201   : > { %2787 = vmatpush3.bf16.msra.mxu1 %v1468_v48  ;;  %v2076_v48 = vrot.slane %v1961_v41, 4 }
 0x202   : > { %2796 = vmatprep.subr.bf16.mxu1 %v3122_v49 }
 0x204   : > { %2781 = vmatmul.mubr.msk.bf16.gmra.mrb[4].mxu1 %vm281_vm0, %v1356_v51 }
 0x205   : > { %2788 = vmatprep.mubr.msk.bf16.mxu1 %vm281_vm0, %v1331_v27  ;;  %v1758_v27 = vsel %vm341_vm4, %v1755_v20, %v1757_v21 }
 0x20c   : > { %2789 = vmatmul.mubr.msk.bf16.vlgmr.msra.gmra.mrb[0].mxu1 %vm281_vm0, %v1332_v30 }
 0x20d   : > { %2797 = vmatpush3.bf16.msra.mxu1 %v3122_v49  ;;  %2792 = vmatprep.mubr.msk.bf16.mxu1 %vm281_vm0, %v1333_v36  ;;  %v1957_v49 = vld [vmem:[#allocation3 + $0x72] sm:$0xff] }
 0x20e   : > { %3019 = vmatprep.subr.msk.bf16.mxu1 %vm372_vm3, %v3123_v52  ;;  %v1963_v50 = vpack.c.bf16 %v1957_v49, %v1956_v47 }
 0x211   : > { %2799 = vmatpush3.bf16.msra.mxu1 %v1552_v53 }
 0x212   : > { %2808 = vmatprep.subr.bf16.mxu1 %v3124_v54 }
 0x214   : > { %2793 = vmatmul.mubr.msk.bf16.gmra.mrb[4].mxu1 %vm281_vm0, %v1334_v42 }
 0x215   : > { %2800 = vmatprep.mubr.msk.bf16.mxu1 %vm281_vm0, %v1332_v30  ;;  %v1759_v30 = vrot.slane %v1641_v26, 4 }
 0x217   : > { %v1760_v31 = vsel %vm341_vm4, %v1757_v21, %v1759_v30 }
 0x21c   : > { %2801 = vmatmul.mubr.msk.bf16.vlgmr.msra.gmra.mrb[0].mxu1 %vm281_vm0, %v1333_v36  ;;  %v1951_v36 = vld [vmem:[#allocation3 + $0x12] sm:$0xff] }
 0x21d   : > { %2809 = vmatpush3.bf16.msra.mxu1 %v3124_v54  ;;  %2804 = vmatprep.mubr.msk.bf16.mxu1 %vm281_vm0, %v1334_v42  ;;  %v1960_v37 = vpack.c.bf16 %v1951_v36, %v1950_v35  ;;  %v1954_v42 = vld [vmem:[#allocation3 + $0x42] sm:$0xff]  ;;  %v2080_v54 = vrot.slane %v1963_v50, 4 }
 0x21e   : > { %3020 = vmatprep.subr.msk.bf16.mxu1 %vm372_vm3, %v3125_v55  ;;  %v1962_v44 = vpack.c.bf16 %v1955_v39, %v1954_v42  ;;  %v1958_v55 = vld [vmem:[#allocation3 + $0x82] sm:$0xff] }
 0x21f   : > { %v2075_v51 = vrot.slane %v1960_v37, 4 }
 0x220   : > { %v2078_v53 = vrot.slane %v1962_v44, 4 }
 0x221   : > { %2811 = vmatpush3.bf16.msra.mxu1 %v1668_v56  ;;  %v2077_v52 = vsel %vm341_vm4, %v2075_v51, %v2076_v48  ;;  %v1959_v56 = vld [vmem:[#allocation3 + $0x92] sm:$0xff] }
 0x222   : > { %2820 = vmatprep.subr.bf16.mxu1 %v3126_v57  ;;  %v2079_v58 = vsel %vm341_vm4, %v2076_v48, %v2078_v53  ;;  %v1964_v59 = vpack.c.bf16 %v1959_v56, %v1958_v55 }
 0x224   : > { %2805 = vmatmul.mubr.msk.bf16.gmra.mrb[4].mxu1 %vm281_vm0, %v1335_v46  ;;  %v3134_v46 = vld [vmem:[#allocation9 + $0x60] sm:$0xff]   ;;  %v2082_v62 = vrot.slane %v1964_v59, 4 }
 0x225   : > { %2812 = vmatprep.mubr.msk.bf16.mxu1 %vm281_vm0, %v1637_v60  ;;  %v2081_v60 = vsel %vm341_vm4, %v2078_v53, %v2080_v54 }
 0x226   : > { %v2083_v63 = vsel %vm341_vm4, %v2080_v54, %v2082_v62 }
 0x22c   : > { %2813 = vmatmul.mubr.msk.bf16.vlgmr.msra.gmra.mrb[0].mxu1 %vm281_vm0, %v1638_v0 }
 0x22d   : > { %2821 = vmatpush3.bf16.msra.mxu1 %v3126_v57  ;;  %2816 = vmatprep.mubr.msk.bf16.mxu1 %vm281_vm0, %v1639_v6  ;;  %v3135_v57 = vld [vmem:[#allocation9 + $0x68] ss:$0 sps:$4 sm:$0x33]  }
 0x22e   : > { %3021 = vmatprep.subr.msk.bf16.mxu1 %vm372_vm3, %v3127_v2  ;;  %v2198_v61 = vsel %vm372_vm3, %v3135_v57, 0 }
 0x231   : > { %2823 = vmatpush3.bf16.msra.mxu1 %v1783_v7 }
 0x232   : > { %2832 = vmatprep.subr.bf16.mxu1 %v3128_v13 }
 0x234   : > { %2817 = vmatmul.mubr.msk.bf16.gmra.mrb[4].mxu1 %vm281_vm0, %v1640_v17 }
 0x235   : > { %2824 = vmatprep.mubr.msk.bf16.mxu1 %vm281_vm0, %v1754_v19 }
 0x23c   : > { %2825 = vmatmul.mubr.msk.bf16.vlgmr.msra.gmra.mrb[0].mxu1 %vm281_vm0, %v1756_v25 }
 0x23d   : > { %2833 = vmatpush3.bf16.msra.mxu1 %v3128_v13  ;;  %2828 = vmatprep.mubr.msk.bf16.mxu1 %vm281_vm0, %v1758_v27 }
 0x23e   : > { %3022 = vmatprep.subr.msk.bf16.mxu1 %vm372_vm3, %v3129_v24 }
 0x241   : > { %2835 = vmatpush3.bf16.msra.mxu1 %v1875_v28 }
 0x242   : > { %2844 = vmatprep.subr.bf16.mxu1 %v3130_v29 }
 0x244   : > { %2829 = vmatmul.mubr.msk.bf16.gmra.mrb[4].mxu1 %vm281_vm0, %v1760_v31 }
 0x245   : > { %2836 = vmatprep.mubr.msk.bf16.mxu1 %vm281_vm0, %v1638_v0  ;;  %v2548_v0 = vld [vmem:[%s3828_s4] ss:$0 sm:$0xff] }
 0x24c   : > { %2837 = vmatmul.mubr.msk.bf16.vlgmr.msra.gmra.mrb[0].mxu1 %vm281_vm0, %v1639_v6 }
 0x24d   : > { %2845 = vmatpush3.bf16.msra.mxu1 %v3130_v29  ;;  %2840 = vmatprep.mubr.msk.bf16.mxu1 %vm281_vm0, %v1640_v17 }
 0x24e   : > { %3023 = vmatprep.subr.msk.bf16.mxu1 %vm372_vm3, %v3131_v32 }
 0x251   : > { %2847 = vmatpush3.bf16.msra.mxu1 %v1991_v33 }
 0x252   : > { %2856 = vmatprep.subr.bf16.mxu1 %v3132_v34 }
 0x254   : > { %2841 = vmatmul.mubr.msk.bf16.gmra.mrb[4].mxu1 %vm281_vm0, %v1641_v26 }
 0x255   : > { %2848 = vmatprep.mubr.msk.bf16.mxu1 %vm281_vm0, %v1960_v37 }
 0x25c   : > { %2849 = vmatmul.mubr.msk.bf16.vlgmr.msra.gmra.mrb[0].mxu1 %vm281_vm0, %v1961_v41 }
 0x25d   : > { %2857 = vmatpush3.bf16.msra.mxu1 %v3132_v34  ;;  %2852 = vmatprep.mubr.msk.bf16.mxu1 %vm281_vm0, %v1962_v44 }
 0x25e   : > { %3024 = vmatprep.subr.msk.bf16.mxu1 %vm372_vm3, %v3133_v43 }
 0x261   : > { %2859 = vmatpush3.bf16.msra.mxu1 %v2106_v45 }
 0x262   : > { %2868 = vmatprep.subr.bf16.mxu1 %v3134_v46 }
 0x264   : > { %2853 = vmatmul.mubr.msk.bf16.gmra.mrb[4].mxu1 %vm281_vm0, %v1963_v50 }
 0x265   : > { %2860 = vmatprep.mubr.msk.bf16.mxu1 %vm281_vm0, %v2077_v52 }
 0x26c   : > { %2861 = vmatmul.mubr.msk.bf16.vlgmr.msra.gmra.mrb[0].mxu1 %vm281_vm0, %v2079_v58 }
 0x26d   : > { %2869 = vmatpush3.bf16.msra.mxu1 %v3134_v46  ;;  %2864 = vmatprep.mubr.msk.bf16.mxu1 %vm281_vm0, %v2081_v60 }
 0x26e   : > { %3025 = vmatprep.subr.msk.bf16.mxu1 %vm372_vm3, %v3135_v57 }
 0x271   : > { %2871 = vmatpush3.bf16.msra.mxu1 %v2198_v61 }
 0x274   : > { %2865 = vmatmul.mubr.msk.bf16.gmra.mrb[4].mxu1 %vm281_vm0, %v2083_v63 }
 0x275   : > { %2872 = vmatprep.mubr.msk.bf16.mxu1 %vm281_vm0, %v1961_v41 }
 0x27c   : > { %2873 = vmatmul.mubr.msk.bf16.vlgmr.msra.gmra.mrb[0].mxu1 %vm281_vm0, %v1962_v44 }
 0x27d   : > { %2876 = vmatprep.mubr.msk.bf16.mxu1 %vm281_vm0, %v1963_v50 }
 0x284   : > { %2877 = vmatmul.mubr.msk.bf16.gmra.mrb[4].mxu1 %vm281_vm0, %v1964_v59 }
 0x34f   : > { %v2874_v1 = vpop.f32.mrb[0].mxu1 }
 0x350   : > { %v2282_v2 = vadd.f32 %v2874_v1, %v2548_v0  ;;  %v2234_v6 = vpop.f32.mrb[1].mxu1 }
 0x351   : > { %v2280_v7 = vadd.f32 %v2548_v0, %v2234_v6  ;;  %v2875_v13 = vpop.f32.mrb[2].mxu1 }
 0x352   : > { %v2290_v14 = vmax.f32 %v2282_v2, 0.0  ;;  %v2283_v15 = vadd.f32 %v2875_v13, %v2548_v0  ;;  %v2237_v16 = vpop.f32.mrb[3].mxu1 }
 0x353   : > { %v2288_v17 = vmax.f32 %v2280_v7, 0.0  ;;  %v2281_v18 = vadd.f32 %v2548_v0, %v2237_v16 }
 0x354   : > { %v2298_v19 = vadd.f32 %v2290_v14, %v3566_v5  ;;  %v2291_v20 = vmax.f32 %v2283_v15, 0.0 }
 0x355   : > { %v2296_v21 = vadd.f32 %v2288_v17, %v3560_v3  ;;  %v2289_v22 = vmax.f32 %v2281_v18, 0.0 }
 0x356   : > { %v2306_v23 = vmax.f32 %v2298_v19, 0.0  ;;  %v2299_v24 = vadd.f32 %v2291_v20, %v3577_v8 }
 0x357   : > { %v2304_v25 = vmax.f32 %v2296_v21, 0.0  ;;  %v2297_v26 = vadd.f32 %v2289_v22, %v3563_v4  ;;  %v2878_v27 = vpop.f32.mrb[4].mxu1 }
 0x358   : > { %2314 = vst.msk [vmem:[%s3751_s11 + $0x10] sm:$0xff] %vm281_vm0, %v2306_v23  ;;  %v2307_v5 = vmax.f32 %v2299_v24, 0.0  ;;  %v2286_v28 = vadd.f32 %v2878_v27, %v2548_v0  ;;  %v2250_v3 = vpop.f32.mrb[5].mxu1 }
 0x359   : > { %2312 = vst.msk [vmem:[%s3751_s11] sm:$0xff] %vm281_vm0, %v2304_v25  ;;  %v2305_v8 = vmax.f32 %v2297_v26, 0.0  ;;  %v2284_v29 = vadd.f32 %v2548_v0, %v2250_v3  ;;  %v2879_v4 = vpop.f32.mrb[6].mxu1 }
 0x35a   : > { %2315 = vst.msk [vmem:[%s3751_s11 + $0x18] sm:$0xff] %vm281_vm0, %v2307_v5  ;;  %v2294_v30 = vmax.f32 %v2286_v28, 0.0  ;;  %v2287_v31 = vadd.f32 %v2879_v4, %v2548_v0  ;;  %v2253_v32 = vpop.f32.mrb[7].mxu1 }
 0x35b   : > { %2313 = vst.msk [vmem:[%s3751_s11 + $0x8] sm:$0xff] %vm281_vm0, %v2305_v8  ;;  %v2292_v33 = vmax.f32 %v2284_v29, 0.0  ;;  %v2285_v34 = vadd.f32 %v2548_v0, %v2253_v32 }
 0x35c   : > { %v2302_v35 = vadd.f32 %v2294_v30, %v3590_v11  ;;  %v2295_v36 = vmax.f32 %v2287_v31, 0.0 }
 0x35d   : > { %v2300_v37 = vadd.f32 %v2292_v33, %v3580_v9  ;;  %v2293_v38 = vmax.f32 %v2285_v34, 0.0 }
 0x35e   : > { %v2310_v39 = vmax.f32 %v2302_v35, 0.0  ;;  %v2303_v40 = vadd.f32 %v2295_v36, %v3597_v12 }
 0x35f   : > { %v2308_v41 = vmax.f32 %v2300_v37, 0.0  ;;  %v2301_v42 = vadd.f32 %v2293_v38, %v3583_v10 }
 0x360   : > { %2318 = vst.msk [vmem:[%s3751_s11 + $0x30] sm:$0xff] %vm281_vm0, %v2310_v39  ;;  %v2311_v43 = vmax.f32 %v2303_v40, 0.0 }
 0x361   : > { %2316 = vst.msk [vmem:[%s3751_s11 + $0x20] sm:$0xff] %vm281_vm0, %v2308_v41  ;;  %v2309_v9 = vmax.f32 %v2301_v42, 0.0 }
 0x362   : > { %2319 = vst.msk [vmem:[%s3751_s11 + $0x38] sm:$0xff] %vm281_vm0, %v2311_v43 }
 0x363   : > { %2317 = vst.msk [vmem:[%s3751_s11 + $0x28] sm:$0xff] %vm281_vm0, %v2309_v9 }
 0x364   : > { %3235 = shalt.err (!%p3232_p2)
}
 0x365   : > { %s3236_s6 = scalar_lea.hbm %s3772_s9, 1024  ;;  %s3240_s8 = scalar_lea.hbm %s3829_s5, 2048 }
 0x366   : > { %p3237_p13 = scmp.ne.s32.totalorder %s3772_s9, %s3236_s6  ;;  %p3241_p4 = scmp.lt.u32.totalorder %s3772_s9, %s3829_s5 }
 0x367   : > { %p3242_p5 = scmp.lt.u32.totalorder %s3240_s8, %s3236_s6  ;;  %p3244_p11 = scmp.lt.u32.totalorder %s3236_s6, %s3772_s9 }
 0x368   : > { %p3238_p6 = pnand %p3237_p13, %p3843_p0 }
 0x369   : > { %p3243_p8 = por %p3242_p5, %p3241_p4 }
 0x36a   : > { %p3239_p10 = pneg %p3238_p6 }
 0x36b   : > { %p3245_p1 = por %p3244_p11, %p3243_p8 }
 0x36d   : > { %p3246_p3 = pnand %p3245_p1, %p3239_p10 }
 0x36f   : > { %3249 = shalt.err (!%p3246_p3)
}
 0x370   : > { %s3303_s28 = smov 128   ;;  %s3304_s15 = smov 8  }
 0x371   : > { %3036 = dma.vmem_to_hbm [thread:$0]  (%p3843_p0), %s3774_s30, 1024, %s3772_s9, %s2321_s22, %s3303_s28, %s3303_s28, %s3304_s15  }
 0x372 PF: > { %s2349_s16 = sand.u32 1, %s3280_s18   ;;  %p3844_p7 = scmp.ne.s32.totalorder %s3834_s25, 0 }
 0x373   : > { %p3845_p9 = scmp.ge.s32.totalorder %s3292_s21, 2  ;;  %s2350_s12 = scalar_lea.sflag [#allocation6], %s2349_s16 }
 0x375   : > { %p3050_p12 = pnand %p3845_p9, %p3844_p7 }
 0x377   : > { %3275 = dma.done.wait (!%p3050_p12), %s2350_s12, 1024  }
 0x378   : > { %3277 = vsyncadd (!%p3050_p12), %s2350_s12, 4294966272  ;;  %p19_p2 = scmp.ge.s32.totalorder %s3445_s14, 4   ;;  %s3846_s18 = smov %s3284_s19 }
 0x379   : > { %s3847_s19 = smov %s3288_s20  ;;  %s3848_s20 = smov %s3461_s27 }
 0x37a   : > { %s3849_s21 = smov %s3445_s14  ;;  %21 = sbr.rel (!%p19_p2) target bundleno = 6 (0x6), region = 113 }
 0x381   :  { %2355 = vsyncpa [#allocation5], 1 }
 0x382   :  { %2357 = vsyncpa [#allocation5 + $0x1], 1 }
 0x383   :  { %2358 = vsyncpa [#allocation8], 1 }
 0x384   :  { %2359 = vsyncpa [#allocation6], 1 }
 0x385   :  { %2361 = vsyncpa [#allocation6 + $0x1], 1 }

</bundles_post_ra>
